<compile_context>
chip_gen: v7x
topology: tpu7x:2x2x1
jax: 0.10.0
libtpu: 0.0.40
codegen_flags: <defaults>
</compile_context>

<pallas_src>
import functools
import math

import jax
import jax.numpy as jnp
from jax import lax
from jax.experimental import pallas as pl
from jax.experimental.pallas import tpu as pltpu


def _pick_tile(t, cap=256):
    """Largest multiple-of-8 divisor of t that is <= cap; t itself if t <= cap.

    Fails loudly (instead of silently using tq = t and blowing VMEM) when no
    valid tile exists.  Use cap=128 on v5e (128x128 MXU, 16 MiB default scoped
    VMEM); 256 on v6e / v7x (256x256 MXU).
    """
    if t <= cap:
        return t
    cand = (cap // 8) * 8
    while cand >= 8:
        if t % cand == 0:
            return cand
        cand -= 8
    raise ValueError(
        f"sequence length {t} > {cap} has no multiple-of-8 tile divisor <= {cap}; "
        f"pad the sequence or pass an explicit q_tile")


def _vmem_limit_bytes(tq, tkv, emb, heads, s, out_itemsize):
    """Rough VMEM budget (double-buffered blocks + scratch + temps) with headroom."""
    bf = 2                                     # bf16 compute dtype
    pad8 = lambda n: ((n + 7) // 8) * 8
    pad128 = lambda n: ((n + 127) // 128) * 128
    xq = 2 * tq * emb * bf                     # query-row x block, double-buffered
    xkv = 2 * tkv * emb * bf                   # kv-row x block, double-buffered
    w = 3 * 2 * emb * emb * bf                 # three block-diag weights
    out = 2 * tq * emb * out_itemsize
    q_scr = heads * pad8(tq) * pad128(s) * bf
    acc = heads * pad8(tq) * pad128(s) * 4
    ml = 2 * heads * pad8(tq) * 128 * 4        # (heads, tq, 1) pads lanes to 128
    temps = 4 * tq * tkv * 4 + 2 * tkv * emb * bf + tq * emb * 4
    est = xq + xkv + w + out + q_scr + acc + ml + temps
    # generous margin for Mosaic temporaries; cap at v7x physical VMEM (64 MiB)
    return int(min(64 * 1024 * 1024, max(32 * 1024 * 1024, 2 * est)))


def _flash_attn_kernel(xq_ref, xkv_ref, wq_ref, wk_ref, wv_ref, o_ref,
                       q_scr, m_scr, l_scr, acc_scr,
                       *, heads, s, tq, tkv, nkv, causal):
    """Grid = (batch, q tiles, kv tiles); kv is the (arbitrary) reduction axis.

    xq_ref  : (1, tq, emb)  bf16  query-row slice of x
    xkv_ref : (1, tkv, emb) bf16  key/value-row slice of x
    wq/wk/wv_ref : (emb, emb) bf16 block-diagonal (transpose + scale folded in)
    o_ref   : (1, tq, emb)  output tile (written at the last needed kv step)
    q_scr   : (heads, tq, s)  bf16   per-head Q for this q tile
    m_scr   : (heads, tq, 1)  f32    online-softmax running max
    l_scr   : (heads, tq, 1)  f32    online-softmax running sum
    acc_scr : (heads, tq, s)  f32    online-softmax running weighted V
    """
    j = pl.program_id(1)
    kk = pl.program_id(2)
    cdt = q_scr.dtype                           # bf16 MXU compute dtype
    neg = jnp.float32(-1e30)                    # finite "masked" value (no -inf/NaN path)

    # ---- once per (batch row, q tile): project Q, reset online-softmax state
    @pl.when(kk == 0)
    def _init():
        qf = jnp.dot(xq_ref[0], wq_ref[...],
                     preferred_element_type=jnp.float32).astype(cdt)   # (tq, emb)
        for h in range(heads):                  # hoist per-head slicing out of kv loop
            q_scr[h] = qf[:, h * s:(h + 1) * s]
        m_scr[...] = jnp.full_like(m_scr, neg)
        l_scr[...] = jnp.zeros_like(l_scr)
        acc_scr[...] = jnp.zeros_like(acc_scr)

    qk_dims = (((1,), (1,)), ((), ()))   # (tq,s) x (tkv,s) -> (tq,tkv)
    pv_dims = (((1,), (0,)), ((), ()))   # (tq,tkv) x (tkv,s) -> (tq,s)

    def process(apply_mask):
        xkv = xkv_ref[0]                                               # (tkv, emb)
        kf = jnp.dot(xkv, wk_ref[...],
                     preferred_element_type=jnp.float32).astype(cdt)   # (tkv, emb)
        vf = jnp.dot(xkv, wv_ref[...],
                     preferred_element_type=jnp.float32).astype(cdt)
        if apply_mask:
            # diagonal tile only (tkv == tq): strictly-future positions masked
            row = lax.broadcasted_iota(jnp.int32, (tq, tkv), 0)
            col = lax.broadcasted_iota(jnp.int32, (tq, tkv), 1)
            allowed = col <= row
        for h in range(heads):                  # static unroll over heads
            lo = h * s
            kh = kf[:, lo:lo + s]               # (tkv, s)
            vh = vf[:, lo:lo + s]
            sc = lax.dot_general(q_scr[h], kh, qk_dims,
                                 preferred_element_type=jnp.float32)   # (tq,tkv) f32
            if apply_mask:
                sc = jnp.where(allowed, sc, neg)
            m_prev = m_scr[h]                                          # (tq, 1)
            m_new = jnp.maximum(m_prev, jnp.max(sc, axis=-1, keepdims=True))
            alpha = jnp.exp(m_prev - m_new)                            # (tq, 1)
            p = jnp.exp(sc - m_new)             # unnormalized; normalize after PV
            l_scr[h] = alpha * l_scr[h] + jnp.sum(p, axis=-1, keepdims=True)
            acc_scr[h] = alpha * acc_scr[h] + lax.dot_general(
                p.astype(cdt), vh, pv_dims, preferred_element_type=jnp.float32)
            m_scr[h] = m_new

    if causal:
        # Skip kv tiles entirely in the future (kk > j); mask only the diagonal.
        @pl.when(kk < j)
        def _off_diag():
            process(apply_mask=False)

        @pl.when(kk == j)
        def _diag():
            process(apply_mask=True)

        last_k = j
    else:
        process(apply_mask=False)
        last_k = nkv - 1

    # ---- finalize: divide by the running sum (EUP reciprocal) and do one
    # lane-dense (tq, emb) store.
    @pl.when(kk == last_k)
    def _finalize():
        outs = []
        for h in range(heads):
            inv = pl.reciprocal(l_scr[h], approx=True)                 # (tq, 1)
            outs.append(acc_scr[h] * inv)
        o_ref[0] = jnp.concatenate(outs, axis=-1).astype(o_ref.dtype)


def self_attention_narrow(x, wq, wk, wv, *, heads, mask=False,
                          q_tile_max=256, q_tile=None,
                          compute_dtype=jnp.bfloat16):
    """x: (b, t, emb) f32. wq/wk/wv: (s, s) nn.Linear weights. Returns (b, t, emb) f32."""
    b, t, emb = x.shape
    assert emb % heads == 0, "emb must be divisible by heads"
    s = emb // heads
    assert wq.shape == (s, s) and wk.shape == (s, s) and wv.shape == (s, s)

    # Fold the nn.Linear transpose and the s**-0.25 q/k scaling into
    # block-diagonal (emb, emb) weights: (X @ Wblk)[:, h*s:(h+1)*s] = X_h @ (W.T * c).
    scale = jnp.float32(s ** (-0.25))
    eye = jnp.eye(heads, dtype=jnp.float32)
    wq_blk = jnp.kron(eye, wq.T.astype(jnp.float32) * scale).astype(compute_dtype)
    wk_blk = jnp.kron(eye, wk.T.astype(jnp.float32) * scale).astype(compute_dtype)
    wv_blk = jnp.kron(eye, wv.T.astype(jnp.float32)).astype(compute_dtype)
    x_c = x.astype(compute_dtype)               # halves HBM->VMEM traffic for x

    tq = q_tile if q_tile is not None else _pick_tile(t, q_tile_max)
    if t % tq != 0 or (tq != t and tq % 8 != 0):
        raise ValueError(f"q_tile={tq} must divide t={t} and be a multiple of 8 (or equal t)")
    tkv = tq                                    # kv tile == q tile -> diagonal tile is kk == j
    nq = t // tq
    nkv = t // tkv

    kernel = functools.partial(_flash_attn_kernel, heads=heads, s=s,
                               tq=tq, tkv=tkv, nkv=nkv, causal=mask)

    if mask:
        # Clamp the kv block index for skipped (future) tiles so no DMA is issued.
        xkv_map = lambda i, j, k: (i, jnp.minimum(k, j), 0)
    else:
        xkv_map = lambda i, j, k: (i, k, 0)

    return pl.pallas_call(
        kernel,
        out_shape=jax.ShapeDtypeStruct((b, t, emb), x.dtype),
        grid_spec=pltpu.PrefetchScalarGridSpec(
            num_scalar_prefetch=0,
            grid=(b, nq, nkv),
            in_specs=[
                pl.BlockSpec((1, tq, emb), lambda i, j, k: (i, j, 0)),    # x (query rows)
                pl.BlockSpec((1, tkv, emb), xkv_map),                      # x (kv rows)
                pl.BlockSpec((emb, emb), lambda i, j, k: (0, 0)),          # Wq block-diag
                pl.BlockSpec((emb, emb), lambda i, j, k: (0, 0)),          # Wk block-diag
                pl.BlockSpec((emb, emb), lambda i, j, k: (0, 0)),          # Wv block-diag
            ],
            out_specs=pl.BlockSpec((1, tq, emb), lambda i, j, k: (i, j, 0)),
            scratch_shapes=[
                pltpu.VMEM((heads, tq, s), compute_dtype),   # Q per head
                pltpu.VMEM((heads, tq, 1), jnp.float32),     # running max
                pltpu.VMEM((heads, tq, 1), jnp.float32),     # running sum
                pltpu.VMEM((heads, tq, s), jnp.float32),     # running weighted V
            ],
        ),
        compiler_params=pltpu.CompilerParams(
            # batch rows AND q tiles are independent (megacore gets work even at
            # b=1); the kv axis carries the online-softmax state -> arbitrary.
            dimension_semantics=("parallel", "parallel", "arbitrary"),
            vmem_limit_bytes=_vmem_limit_bytes(
                tq, tkv, emb, heads, s, jnp.dtype(x.dtype).itemsize)),
    )(x_c, x_c, wq_blk, wk_blk, wv_blk)


def self_attention_narrow_ref(x, wq, wk, wv, *, heads, mask=False):
    """Pure-JAX f32 reference mirroring the PyTorch forward."""
    b, t, e = x.shape
    s = e // heads
    xh = x.reshape(b, t, heads, s)
    q = jnp.einsum('bths,os->btho', xh, wq)
    k = jnp.einsum('bths,os->btho', xh, wk)
    v = jnp.einsum('bths,os->btho', xh, wv)
    q = jnp.transpose(q, (0, 2, 1, 3)) / s ** 0.25   # (b, h, t, s)
    k = jnp.transpose(k, (0, 2, 1, 3)) / s ** 0.25
    v = jnp.transpose(v, (0, 2, 1, 3))
    dot = jnp.einsum('bhqs,bhks->bhqk', q, k)
    if mask:
        row = lax.broadcasted_iota(jnp.int32, (t, t), 0)
        col = lax.broadcasted_iota(jnp.int32, (t, t), 1)
        dot = jnp.where(col > row, -jnp.inf, dot)
    p = jax.nn.softmax(dot, axis=-1)
    out = jnp.einsum('bhqk,bhks->bhqs', p, v)        # (b, h, t, s)
    out = jnp.transpose(out, (0, 2, 1, 3)).reshape(b, t, e)
    return out


if __name__ == "__main__":
    # Small shapes consistent with the module: batch=2, seq=16, emb=32, heads=4.
    b, t, emb, heads = 2, 16, 32, 4
    s = emb // heads

    key = jax.random.PRNGKey(0)
    kx, kq, kk_, kv_ = jax.random.split(key, 4)

    x = jax.random.normal(kx, (b, t, emb), dtype=jnp.float32)

    # nn.Linear-style uniform(-1/sqrt(s), 1/sqrt(s)) init.
    bound = 1.0 / math.sqrt(s)
    wq = jax.random.uniform(kq, (s, s), jnp.float32, -bound, bound)
    wk = jax.random.uniform(kk_, (s, s), jnp.float32, -bound, bound)
    wv = jax.random.uniform(kv_, (s, s), jnp.float32, -bound, bound)

    for use_mask in (False, True):
        for qt in (None, 8):   # single-tile path and multi-tile kv-streaming path
            out = self_attention_narrow(x, wq, wk, wv, heads=heads,
                                        mask=use_mask, q_tile=qt)
            out = jax.block_until_ready(out)
            ref = self_attention_narrow_ref(x, wq, wk, wv, heads=heads,
                                            mask=use_mask)
            assert out.shape == (b, t, emb)
            # bf16 MXU operands + approx reciprocal -> bf16-level tolerance vs f32 ref
            assert jnp.allclose(out, ref, atol=2e-2, rtol=2e-2), \
                f"mismatch vs reference (mask={use_mask}, q_tile={qt})"

    print("KERNEL_OK")
</pallas_src>

<mosaic_0001>
module attributes {stable_mosaic.version = 11 : i64} {
  func.func @_flash_attn_kernel(%arg0: i32, %arg1: i32, %arg2: i32, %arg3: memref<1x16x32xbf16, #tpu.memory_space<vmem>>, %arg4: memref<1x16x32xbf16, #tpu.memory_space<vmem>>, %arg5: memref<32x32xbf16, #tpu.memory_space<vmem>>, %arg6: memref<32x32xbf16, #tpu.memory_space<vmem>>, %arg7: memref<32x32xbf16, #tpu.memory_space<vmem>>, %arg8: memref<1x16x32xf32, #tpu.memory_space<vmem>>, %arg9: memref<4x16x8xbf16, #tpu.memory_space<vmem>>, %arg10: memref<4x16x1xf32, #tpu.memory_space<vmem>>, %arg11: memref<4x16x1xf32, #tpu.memory_space<vmem>>, %arg12: memref<4x16x8xf32, #tpu.memory_space<vmem>>) attributes {dimension_semantics = [#tpu.dimension_semantics<parallel>, #tpu.dimension_semantics<parallel>, #tpu.dimension_semantics<arbitrary>], iteration_bounds = array<i64: 2, 1, 1>, scalar_prefetch = 0 : i64, scratch_operands = 4 : i64, tpu.core_type = #tpu.core_type<tc>, window_params = [{transform_indices = @transform_0, window_bounds = array<i64: 1, 16, 32>}, {transform_indices = @transform_1, window_bounds = array<i64: 1, 16, 32>}, {pipeline_mode = #tpu.pipeline_mode<synchronous>, transform_indices = @transform_2, window_bounds = array<i64: 32, 32>}, {pipeline_mode = #tpu.pipeline_mode<synchronous>, transform_indices = @transform_3, window_bounds = array<i64: 32, 32>}, {pipeline_mode = #tpu.pipeline_mode<synchronous>, transform_indices = @transform_4, window_bounds = array<i64: 32, 32>}, {transform_indices = @transform_5, window_bounds = array<i64: 1, 16, 32>}]} {
    %c0_i32 = arith.constant 0 : i32
    %0 = arith.cmpi eq, %arg2, %c0_i32 : i32
    %1 = arith.extui %0 : i1 to i32
    %cst = arith.constant -1.000000e+30 : f32
    %c0_i32_0 = arith.constant 0 : i32
    %2 = arith.cmpi ne, %1, %c0_i32_0 : i32
    scf.if %2 {
      %c0_108 = arith.constant 0 : index
      %c0_109 = arith.constant 0 : index
      %c0_110 = arith.constant 0 : index
      %162 = vector.load %arg3[%c0_108, %c0_109, %c0_110] : memref<1x16x32xbf16, #tpu.memory_space<vmem>>, vector<1x16x32xbf16>
      %163 = vector.shape_cast %162 : vector<1x16x32xbf16> to vector<16x32xbf16>
      %c0_111 = arith.constant 0 : index
      %c0_112 = arith.constant 0 : index
      %164 = vector.load %arg5[%c0_111, %c0_112] : memref<32x32xbf16, #tpu.memory_space<vmem>>, vector<32x32xbf16>
      %cst_113 = arith.constant dense<0.000000e+00> : vector<16x32xf32>
      %165 = tpu.matmul %163, %164, %cst_113 {dimension_numbers = #tpu.dot_dimension_numbers<[1], [0], [0], [1], [0, 0, 1, 1], [], []>} : vector<16x32xbf16>, vector<32x32xbf16>, vector<16x32xf32> -> vector<16x32xf32>
      %166 = arith.truncf %165 : vector<16x32xf32> to vector<16x32xbf16>
      %167 = vector.extract_strided_slice %166 {offsets = [0, 0], sizes = [16, 8], strides = [1, 1]} : vector<16x32xbf16> to vector<16x8xbf16>
      %c0_114 = arith.constant 0 : index
      %c0_115 = arith.constant 0 : index
      %c0_116 = arith.constant 0 : index
      %168 = vector.load %arg9[%c0_114, %c0_115, %c0_116] : memref<4x16x8xbf16, #tpu.memory_space<vmem>>, vector<1x16x8xbf16>
      %169 = vector.shape_cast %168 : vector<1x16x8xbf16> to vector<16x8xbf16>
      %170 = vector.shape_cast %167 : vector<16x8xbf16> to vector<1x16x8xbf16>
      tpu.vector_store %arg9[%c0_114, %c0_115, %c0_116], %170 {strides = array<i32>} : memref<4x16x8xbf16, #tpu.memory_space<vmem>>, vector<1x16x8xbf16>,
      %171 = vector.extract_strided_slice %166 {offsets = [0, 8], sizes = [16, 8], strides = [1, 1]} : vector<16x32xbf16> to vector<16x8xbf16>
      %c1_117 = arith.constant 1 : index
      %c0_118 = arith.constant 0 : index
      %c0_119 = arith.constant 0 : index
      %172 = vector.load %arg9[%c1_117, %c0_118, %c0_119] : memref<4x16x8xbf16, #tpu.memory_space<vmem>>, vector<1x16x8xbf16>
      %173 = vector.shape_cast %172 : vector<1x16x8xbf16> to vector<16x8xbf16>
      %174 = vector.shape_cast %171 : vector<16x8xbf16> to vector<1x16x8xbf16>
      tpu.vector_store %arg9[%c1_117, %c0_118, %c0_119], %174 {strides = array<i32>} : memref<4x16x8xbf16, #tpu.memory_space<vmem>>, vector<1x16x8xbf16>,
      %175 = vector.extract_strided_slice %166 {offsets = [0, 16], sizes = [16, 8], strides = [1, 1]} : vector<16x32xbf16> to vector<16x8xbf16>
      %c2_120 = arith.constant 2 : index
      %c0_121 = arith.constant 0 : index
      %c0_122 = arith.constant 0 : index
      %176 = vector.load %arg9[%c2_120, %c0_121, %c0_122] : memref<4x16x8xbf16, #tpu.memory_space<vmem>>, vector<1x16x8xbf16>
      %177 = vector.shape_cast %176 : vector<1x16x8xbf16> to vector<16x8xbf16>
      %178 = vector.shape_cast %175 : vector<16x8xbf16> to vector<1x16x8xbf16>
      tpu.vector_store %arg9[%c2_120, %c0_121, %c0_122], %178 {strides = array<i32>} : memref<4x16x8xbf16, #tpu.memory_space<vmem>>, vector<1x16x8xbf16>,
      %179 = vector.extract_strided_slice %166 {offsets = [0, 24], sizes = [16, 8], strides = [1, 1]} : vector<16x32xbf16> to vector<16x8xbf16>
      %c3_123 = arith.constant 3 : index
      %c0_124 = arith.constant 0 : index
      %c0_125 = arith.constant 0 : index
      %180 = vector.load %arg9[%c3_123, %c0_124, %c0_125] : memref<4x16x8xbf16, #tpu.memory_space<vmem>>, vector<1x16x8xbf16>
      %181 = vector.shape_cast %180 : vector<1x16x8xbf16> to vector<16x8xbf16>
      %182 = vector.shape_cast %179 : vector<16x8xbf16> to vector<1x16x8xbf16>
      tpu.vector_store %arg9[%c3_123, %c0_124, %c0_125], %182 {strides = array<i32>} : memref<4x16x8xbf16, #tpu.memory_space<vmem>>, vector<1x16x8xbf16>,
      %183 = vector.broadcast %cst : f32 to vector<4x16x1xf32>
      %c0_126 = arith.constant 0 : index
      %c0_127 = arith.constant 0 : index
      %c0_128 = arith.constant 0 : index
      %184 = vector.load %arg10[%c0_126, %c0_127, %c0_128] : memref<4x16x1xf32, #tpu.memory_space<vmem>>, vector<4x16x1xf32>
      tpu.vector_store %arg10[%c0_126, %c0_127, %c0_128], %183 {strides = array<i32>} : memref<4x16x1xf32, #tpu.memory_space<vmem>>, vector<4x16x1xf32>,
      %cst_129 = arith.constant 0.000000e+00 : f32
      %185 = vector.broadcast %cst_129 : f32 to vector<4x16x1xf32>
      %c0_130 = arith.constant 0 : index
      %c0_131 = arith.constant 0 : index
      %c0_132 = arith.constant 0 : index
      %186 = vector.load %arg11[%c0_130, %c0_131, %c0_132] : memref<4x16x1xf32, #tpu.memory_space<vmem>>, vector<4x16x1xf32>
      tpu.vector_store %arg11[%c0_130, %c0_131, %c0_132], %185 {strides = array<i32>} : memref<4x16x1xf32, #tpu.memory_space<vmem>>, vector<4x16x1xf32>,
      %cst_133 = arith.constant 0.000000e+00 : f32
      %187 = vector.broadcast %cst_133 : f32 to vector<4x16x8xf32>
      %c0_134 = arith.constant 0 : index
      %c0_135 = arith.constant 0 : index
      %c0_136 = arith.constant 0 : index
      %188 = vector.load %arg12[%c0_134, %c0_135, %c0_136] : memref<4x16x8xf32, #tpu.memory_space<vmem>>, vector<4x16x8xf32>
      tpu.vector_store %arg12[%c0_134, %c0_135, %c0_136], %187 {strides = array<i32>} : memref<4x16x8xf32, #tpu.memory_space<vmem>>, vector<4x16x8xf32>,
    } else {
    }
    %c0 = arith.constant 0 : index
    %c0_1 = arith.constant 0 : index
    %c0_2 = arith.constant 0 : index
    %3 = vector.load %arg4[%c0, %c0_1, %c0_2] : memref<1x16x32xbf16, #tpu.memory_space<vmem>>, vector<1x16x32xbf16>
    %4 = vector.shape_cast %3 : vector<1x16x32xbf16> to vector<16x32xbf16>
    %c0_3 = arith.constant 0 : index
    %c0_4 = arith.constant 0 : index
    %5 = vector.load %arg6[%c0_3, %c0_4] : memref<32x32xbf16, #tpu.memory_space<vmem>>, vector<32x32xbf16>
    %cst_5 = arith.constant dense<0.000000e+00> : vector<16x32xf32>
    %6 = tpu.matmul %4, %5, %cst_5 {dimension_numbers = #tpu.dot_dimension_numbers<[1], [0], [0], [1], [0, 0, 1, 1], [], []>} : vector<16x32xbf16>, vector<32x32xbf16>, vector<16x32xf32> -> vector<16x32xf32>
    %7 = arith.truncf %6 : vector<16x32xf32> to vector<16x32xbf16>
    %c0_6 = arith.constant 0 : index
    %c0_7 = arith.constant 0 : index
    %8 = vector.load %arg7[%c0_6, %c0_7] : memref<32x32xbf16, #tpu.memory_space<vmem>>, vector<32x32xbf16>
    %cst_8 = arith.constant dense<0.000000e+00> : vector<16x32xf32>
    %9 = tpu.matmul %4, %8, %cst_8 {dimension_numbers = #tpu.dot_dimension_numbers<[1], [0], [0], [1], [0, 0, 1, 1], [], []>} : vector<16x32xbf16>, vector<32x32xbf16>, vector<16x32xf32> -> vector<16x32xf32>
    %10 = arith.truncf %9 : vector<16x32xf32> to vector<16x32xbf16>
    %11 = vector.extract_strided_slice %7 {offsets = [0, 0], sizes = [16, 8], strides = [1, 1]} : vector<16x32xbf16> to vector<16x8xbf16>
    %12 = vector.extract_strided_slice %10 {offsets = [0, 0], sizes = [16, 8], strides = [1, 1]} : vector<16x32xbf16> to vector<16x8xbf16>
    %c0_9 = arith.constant 0 : index
    %c0_10 = arith.constant 0 : index
    %c0_11 = arith.constant 0 : index
    %13 = vector.load %arg9[%c0_9, %c0_10, %c0_11] : memref<4x16x8xbf16, #tpu.memory_space<vmem>>, vector<1x16x8xbf16>
    %14 = vector.shape_cast %13 : vector<1x16x8xbf16> to vector<16x8xbf16>
    %cst_12 = arith.constant dense<0.000000e+00> : vector<16x16xf32>
    %15 = tpu.matmul %14, %11, %cst_12 {dimension_numbers = #tpu.dot_dimension_numbers<[1], [1], [0], [0], [0, 0, 1, 0], [], []>} : vector<16x8xbf16>, vector<16x8xbf16>, vector<16x16xf32> -> vector<16x16xf32>
    %c0_13 = arith.constant 0 : index
    %c0_14 = arith.constant 0 : index
    %c0_15 = arith.constant 0 : index
    %16 = vector.load %arg10[%c0_13, %c0_14, %c0_15] : memref<4x16x1xf32, #tpu.memory_space<vmem>>, vector<1x16x1xf32>
    %17 = vector.shape_cast %16 : vector<1x16x1xf32> to vector<16x1xf32>
    %cst_16 = arith.constant dense<0xFF800000> : vector<16xf32>
    %18 = vector.multi_reduction <maximumf>, %15, %cst_16 [1] : vector<16x16xf32> to vector<16xf32>
    %19 = vector.shape_cast %18 : vector<16xf32> to vector<16x1xf32>
    %20 = arith.maximumf %17, %19 : vector<16x1xf32>
    %21 = arith.subf %17, %20 : vector<16x1xf32>
    %22 = math.exp %21 : vector<16x1xf32>
    %23 = vector.broadcast %20 : vector<16x1xf32> to vector<16x16xf32>
    %24 = arith.subf %15, %23 : vector<16x16xf32>
    %25 = math.exp %24 : vector<16x16xf32>
    %c0_17 = arith.constant 0 : index
    %c0_18 = arith.constant 0 : index
    %c0_19 = arith.constant 0 : index
    %26 = vector.load %arg11[%c0_17, %c0_18, %c0_19] : memref<4x16x1xf32, #tpu.memory_space<vmem>>, vector<1x16x1xf32>
    %27 = vector.shape_cast %26 : vector<1x16x1xf32> to vector<16x1xf32>
    %28 = arith.mulf %22, %27 : vector<16x1xf32>
    %cst_20 = arith.constant dense<0.000000e+00> : vector<16xf32>
    %29 = vector.multi_reduction <add>, %25, %cst_20 [1] : vector<16x16xf32> to vector<16xf32>
    %30 = vector.shape_cast %29 : vector<16xf32> to vector<16x1xf32>
    %31 = arith.addf %28, %30 : vector<16x1xf32>
    %c0_21 = arith.constant 0 : index
    %c0_22 = arith.constant 0 : index
    %c0_23 = arith.constant 0 : index
    %32 = vector.load %arg11[%c0_21, %c0_22, %c0_23] : memref<4x16x1xf32, #tpu.memory_space<vmem>>, vector<1x16x1xf32>
    %33 = vector.shape_cast %32 : vector<1x16x1xf32> to vector<16x1xf32>
    %34 = vector.shape_cast %31 : vector<16x1xf32> to vector<1x16x1xf32>
    tpu.vector_store %arg11[%c0_21, %c0_22, %c0_23], %34 {strides = array<i32>} : memref<4x16x1xf32, #tpu.memory_space<vmem>>, vector<1x16x1xf32>,
    %c0_24 = arith.constant 0 : index
    %c0_25 = arith.constant 0 : index
    %c0_26 = arith.constant 0 : index
    %35 = vector.load %arg12[%c0_24, %c0_25, %c0_26] : memref<4x16x8xf32, #tpu.memory_space<vmem>>, vector<1x16x8xf32>
    %36 = vector.shape_cast %35 : vector<1x16x8xf32> to vector<16x8xf32>
    %37 = vector.broadcast %22 : vector<16x1xf32> to vector<16x8xf32>
    %38 = arith.mulf %37, %36 : vector<16x8xf32>
    %39 = arith.truncf %25 : vector<16x16xf32> to vector<16x16xbf16>
    %cst_27 = arith.constant dense<0.000000e+00> : vector<16x8xf32>
    %40 = tpu.matmul %39, %12, %cst_27 {dimension_numbers = #tpu.dot_dimension_numbers<[1], [0], [0], [1], [0, 0, 1, 1], [], []>} : vector<16x16xbf16>, vector<16x8xbf16>, vector<16x8xf32> -> vector<16x8xf32>
    %41 = arith.addf %38, %40 : vector<16x8xf32>
    %c0_28 = arith.constant 0 : index
    %c0_29 = arith.constant 0 : index
    %c0_30 = arith.constant 0 : index
    %42 = vector.load %arg12[%c0_28, %c0_29, %c0_30] : memref<4x16x8xf32, #tpu.memory_space<vmem>>, vector<1x16x8xf32>
    %43 = vector.shape_cast %42 : vector<1x16x8xf32> to vector<16x8xf32>
    %44 = vector.shape_cast %41 : vector<16x8xf32> to vector<1x16x8xf32>
    tpu.vector_store %arg12[%c0_28, %c0_29, %c0_30], %44 {strides = array<i32>} : memref<4x16x8xf32, #tpu.memory_space<vmem>>, vector<1x16x8xf32>,
    %c0_31 = arith.constant 0 : index
    %c0_32 = arith.constant 0 : index
    %c0_33 = arith.constant 0 : index
    %45 = vector.load %arg10[%c0_31, %c0_32, %c0_33] : memref<4x16x1xf32, #tpu.memory_space<vmem>>, vector<1x16x1xf32>
    %46 = vector.shape_cast %45 : vector<1x16x1xf32> to vector<16x1xf32>
    %47 = vector.shape_cast %20 : vector<16x1xf32> to vector<1x16x1xf32>
    tpu.vector_store %arg10[%c0_31, %c0_32, %c0_33], %47 {strides = array<i32>} : memref<4x16x1xf32, #tpu.memory_space<vmem>>, vector<1x16x1xf32>,
    %48 = vector.extract_strided_slice %7 {offsets = [0, 8], sizes = [16, 8], strides = [1, 1]} : vector<16x32xbf16> to vector<16x8xbf16>
    %49 = vector.extract_strided_slice %10 {offsets = [0, 8], sizes = [16, 8], strides = [1, 1]} : vector<16x32xbf16> to vector<16x8xbf16>
    %c1 = arith.constant 1 : index
    %c0_34 = arith.constant 0 : index
    %c0_35 = arith.constant 0 : index
    %50 = vector.load %arg9[%c1, %c0_34, %c0_35] : memref<4x16x8xbf16, #tpu.memory_space<vmem>>, vector<1x16x8xbf16>
    %51 = vector.shape_cast %50 : vector<1x16x8xbf16> to vector<16x8xbf16>
    %cst_36 = arith.constant dense<0.000000e+00> : vector<16x16xf32>
    %52 = tpu.matmul %51, %48, %cst_36 {dimension_numbers = #tpu.dot_dimension_numbers<[1], [1], [0], [0], [0, 0, 1, 0], [], []>} : vector<16x8xbf16>, vector<16x8xbf16>, vector<16x16xf32> -> vector<16x16xf32>
    %c1_37 = arith.constant 1 : index
    %c0_38 = arith.constant 0 : index
    %c0_39 = arith.constant 0 : index
    %53 = vector.load %arg10[%c1_37, %c0_38, %c0_39] : memref<4x16x1xf32, #tpu.memory_space<vmem>>, vector<1x16x1xf32>
    %54 = vector.shape_cast %53 : vector<1x16x1xf32> to vector<16x1xf32>
    %cst_40 = arith.constant dense<0xFF800000> : vector<16xf32>
    %55 = vector.multi_reduction <maximumf>, %52, %cst_40 [1] : vector<16x16xf32> to vector<16xf32>
    %56 = vector.shape_cast %55 : vector<16xf32> to vector<16x1xf32>
    %57 = arith.maximumf %54, %56 : vector<16x1xf32>
    %58 = arith.subf %54, %57 : vector<16x1xf32>
    %59 = math.exp %58 : vector<16x1xf32>
    %60 = vector.broadcast %57 : vector<16x1xf32> to vector<16x16xf32>
    %61 = arith.subf %52, %60 : vector<16x16xf32>
    %62 = math.exp %61 : vector<16x16xf32>
    %c1_41 = arith.constant 1 : index
    %c0_42 = arith.constant 0 : index
    %c0_43 = arith.constant 0 : index
    %63 = vector.load %arg11[%c1_41, %c0_42, %c0_43] : memref<4x16x1xf32, #tpu.memory_space<vmem>>, vector<1x16x1xf32>
    %64 = vector.shape_cast %63 : vector<1x16x1xf32> to vector<16x1xf32>
    %65 = arith.mulf %59, %64 : vector<16x1xf32>
    %cst_44 = arith.constant dense<0.000000e+00> : vector<16xf32>
    %66 = vector.multi_reduction <add>, %62, %cst_44 [1] : vector<16x16xf32> to vector<16xf32>
    %67 = vector.shape_cast %66 : vector<16xf32> to vector<16x1xf32>
    %68 = arith.addf %65, %67 : vector<16x1xf32>
    %c1_45 = arith.constant 1 : index
    %c0_46 = arith.constant 0 : index
    %c0_47 = arith.constant 0 : index
    %69 = vector.load %arg11[%c1_45, %c0_46, %c0_47] : memref<4x16x1xf32, #tpu.memory_space<vmem>>, vector<1x16x1xf32>
    %70 = vector.shape_cast %69 : vector<1x16x1xf32> to vector<16x1xf32>
    %71 = vector.shape_cast %68 : vector<16x1xf32> to vector<1x16x1xf32>
    tpu.vector_store %arg11[%c1_45, %c0_46, %c0_47], %71 {strides = array<i32>} : memref<4x16x1xf32, #tpu.memory_space<vmem>>, vector<1x16x1xf32>,
    %c1_48 = arith.constant 1 : index
    %c0_49 = arith.constant 0 : index
    %c0_50 = arith.constant 0 : index
    %72 = vector.load %arg12[%c1_48, %c0_49, %c0_50] : memref<4x16x8xf32, #tpu.memory_space<vmem>>, vector<1x16x8xf32>
    %73 = vector.shape_cast %72 : vector<1x16x8xf32> to vector<16x8xf32>
    %74 = vector.broadcast %59 : vector<16x1xf32> to vector<16x8xf32>
    %75 = arith.mulf %74, %73 : vector<16x8xf32>
    %76 = arith.truncf %62 : vector<16x16xf32> to vector<16x16xbf16>
    %cst_51 = arith.constant dense<0.000000e+00> : vector<16x8xf32>
    %77 = tpu.matmul %76, %49, %cst_51 {dimension_numbers = #tpu.dot_dimension_numbers<[1], [0], [0], [1], [0, 0, 1, 1], [], []>} : vector<16x16xbf16>, vector<16x8xbf16>, vector<16x8xf32> -> vector<16x8xf32>
    %78 = arith.addf %75, %77 : vector<16x8xf32>
    %c1_52 = arith.constant 1 : index
    %c0_53 = arith.constant 0 : index
    %c0_54 = arith.constant 0 : index
    %79 = vector.load %arg12[%c1_52, %c0_53, %c0_54] : memref<4x16x8xf32, #tpu.memory_space<vmem>>, vector<1x16x8xf32>
    %80 = vector.shape_cast %79 : vector<1x16x8xf32> to vector<16x8xf32>
    %81 = vector.shape_cast %78 : vector<16x8xf32> to vector<1x16x8xf32>
    tpu.vector_store %arg12[%c1_52, %c0_53, %c0_54], %81 {strides = array<i32>} : memref<4x16x8xf32, #tpu.memory_space<vmem>>, vector<1x16x8xf32>,
    %c1_55 = arith.constant 1 : index
    %c0_56 = arith.constant 0 : index
    %c0_57 = arith.constant 0 : index
    %82 = vector.load %arg10[%c1_55, %c0_56, %c0_57] : memref<4x16x1xf32, #tpu.memory_space<vmem>>, vector<1x16x1xf32>
    %83 = vector.shape_cast %82 : vector<1x16x1xf32> to vector<16x1xf32>
    %84 = vector.shape_cast %57 : vector<16x1xf32> to vector<1x16x1xf32>
    tpu.vector_store %arg10[%c1_55, %c0_56, %c0_57], %84 {strides = array<i32>} : memref<4x16x1xf32, #tpu.memory_space<vmem>>, vector<1x16x1xf32>,
    %85 = vector.extract_strided_slice %7 {offsets = [0, 16], sizes = [16, 8], strides = [1, 1]} : vector<16x32xbf16> to vector<16x8xbf16>
    %86 = vector.extract_strided_slice %10 {offsets = [0, 16], sizes = [16, 8], strides = [1, 1]} : vector<16x32xbf16> to vector<16x8xbf16>
    %c2 = arith.constant 2 : index
    %c0_58 = arith.constant 0 : index
    %c0_59 = arith.constant 0 : index
    %87 = vector.load %arg9[%c2, %c0_58, %c0_59] : memref<4x16x8xbf16, #tpu.memory_space<vmem>>, vector<1x16x8xbf16>
    %88 = vector.shape_cast %87 : vector<1x16x8xbf16> to vector<16x8xbf16>
    %cst_60 = arith.constant dense<0.000000e+00> : vector<16x16xf32>
    %89 = tpu.matmul %88, %85, %cst_60 {dimension_numbers = #tpu.dot_dimension_numbers<[1], [1], [0], [0], [0, 0, 1, 0], [], []>} : vector<16x8xbf16>, vector<16x8xbf16>, vector<16x16xf32> -> vector<16x16xf32>
    %c2_61 = arith.constant 2 : index
    %c0_62 = arith.constant 0 : index
    %c0_63 = arith.constant 0 : index
    %90 = vector.load %arg10[%c2_61, %c0_62, %c0_63] : memref<4x16x1xf32, #tpu.memory_space<vmem>>, vector<1x16x1xf32>
    %91 = vector.shape_cast %90 : vector<1x16x1xf32> to vector<16x1xf32>
    %cst_64 = arith.constant dense<0xFF800000> : vector<16xf32>
    %92 = vector.multi_reduction <maximumf>, %89, %cst_64 [1] : vector<16x16xf32> to vector<16xf32>
    %93 = vector.shape_cast %92 : vector<16xf32> to vector<16x1xf32>
    %94 = arith.maximumf %91, %93 : vector<16x1xf32>
    %95 = arith.subf %91, %94 : vector<16x1xf32>
    %96 = math.exp %95 : vector<16x1xf32>
    %97 = vector.broadcast %94 : vector<16x1xf32> to vector<16x16xf32>
    %98 = arith.subf %89, %97 : vector<16x16xf32>
    %99 = math.exp %98 : vector<16x16xf32>
    %c2_65 = arith.constant 2 : index
    %c0_66 = arith.constant 0 : index
    %c0_67 = arith.constant 0 : index
    %100 = vector.load %arg11[%c2_65, %c0_66, %c0_67] : memref<4x16x1xf32, #tpu.memory_space<vmem>>, vector<1x16x1xf32>
    %101 = vector.shape_cast %100 : vector<1x16x1xf32> to vector<16x1xf32>
    %102 = arith.mulf %96, %101 : vector<16x1xf32>
    %cst_68 = arith.constant dense<0.000000e+00> : vector<16xf32>
    %103 = vector.multi_reduction <add>, %99, %cst_68 [1] : vector<16x16xf32> to vector<16xf32>
    %104 = vector.shape_cast %103 : vector<16xf32> to vector<16x1xf32>
    %105 = arith.addf %102, %104 : vector<16x1xf32>
    %c2_69 = arith.constant 2 : index
    %c0_70 = arith.constant 0 : index
    %c0_71 = arith.constant 0 : index
    %106 = vector.load %arg11[%c2_69, %c0_70, %c0_71] : memref<4x16x1xf32, #tpu.memory_space<vmem>>, vector<1x16x1xf32>
    %107 = vector.shape_cast %106 : vector<1x16x1xf32> to vector<16x1xf32>
    %108 = vector.shape_cast %105 : vector<16x1xf32> to vector<1x16x1xf32>
    tpu.vector_store %arg11[%c2_69, %c0_70, %c0_71], %108 {strides = array<i32>} : memref<4x16x1xf32, #tpu.memory_space<vmem>>, vector<1x16x1xf32>,
    %c2_72 = arith.constant 2 : index
    %c0_73 = arith.constant 0 : index
    %c0_74 = arith.constant 0 : index
    %109 = vector.load %arg12[%c2_72, %c0_73, %c0_74] : memref<4x16x8xf32, #tpu.memory_space<vmem>>, vector<1x16x8xf32>
    %110 = vector.shape_cast %109 : vector<1x16x8xf32> to vector<16x8xf32>
    %111 = vector.broadcast %96 : vector<16x1xf32> to vector<16x8xf32>
    %112 = arith.mulf %111, %110 : vector<16x8xf32>
    %113 = arith.truncf %99 : vector<16x16xf32> to vector<16x16xbf16>
    %cst_75 = arith.constant dense<0.000000e+00> : vector<16x8xf32>
    %114 = tpu.matmul %113, %86, %cst_75 {dimension_numbers = #tpu.dot_dimension_numbers<[1], [0], [0], [1], [0, 0, 1, 1], [], []>} : vector<16x16xbf16>, vector<16x8xbf16>, vector<16x8xf32> -> vector<16x8xf32>
    %115 = arith.addf %112, %114 : vector<16x8xf32>
    %c2_76 = arith.constant 2 : index
    %c0_77 = arith.constant 0 : index
    %c0_78 = arith.constant 0 : index
    %116 = vector.load %arg12[%c2_76, %c0_77, %c0_78] : memref<4x16x8xf32, #tpu.memory_space<vmem>>, vector<1x16x8xf32>
    %117 = vector.shape_cast %116 : vector<1x16x8xf32> to vector<16x8xf32>
    %118 = vector.shape_cast %115 : vector<16x8xf32> to vector<1x16x8xf32>
    tpu.vector_store %arg12[%c2_76, %c0_77, %c0_78], %118 {strides = array<i32>} : memref<4x16x8xf32, #tpu.memory_space<vmem>>, vector<1x16x8xf32>,
    %c2_79 = arith.constant 2 : index
    %c0_80 = arith.constant 0 : index
    %c0_81 = arith.constant 0 : index
    %119 = vector.load %arg10[%c2_79, %c0_80, %c0_81] : memref<4x16x1xf32, #tpu.memory_space<vmem>>, vector<1x16x1xf32>
    %120 = vector.shape_cast %119 : vector<1x16x1xf32> to vector<16x1xf32>
    %121 = vector.shape_cast %94 : vector<16x1xf32> to vector<1x16x1xf32>
    tpu.vector_store %arg10[%c2_79, %c0_80, %c0_81], %121 {strides = array<i32>} : memref<4x16x1xf32, #tpu.memory_space<vmem>>, vector<1x16x1xf32>,
    %122 = vector.extract_strided_slice %7 {offsets = [0, 24], sizes = [16, 8], strides = [1, 1]} : vector<16x32xbf16> to vector<16x8xbf16>
    %123 = vector.extract_strided_slice %10 {offsets = [0, 24], sizes = [16, 8], strides = [1, 1]} : vector<16x32xbf16> to vector<16x8xbf16>
    %c3 = arith.constant 3 : index
    %c0_82 = arith.constant 0 : index
    %c0_83 = arith.constant 0 : index
    %124 = vector.load %arg9[%c3, %c0_82, %c0_83] : memref<4x16x8xbf16, #tpu.memory_space<vmem>>, vector<1x16x8xbf16>
    %125 = vector.shape_cast %124 : vector<1x16x8xbf16> to vector<16x8xbf16>
    %cst_84 = arith.constant dense<0.000000e+00> : vector<16x16xf32>
    %126 = tpu.matmul %125, %122, %cst_84 {dimension_numbers = #tpu.dot_dimension_numbers<[1], [1], [0], [0], [0, 0, 1, 0], [], []>} : vector<16x8xbf16>, vector<16x8xbf16>, vector<16x16xf32> -> vector<16x16xf32>
    %c3_85 = arith.constant 3 : index
    %c0_86 = arith.constant 0 : index
    %c0_87 = arith.constant 0 : index
    %127 = vector.load %arg10[%c3_85, %c0_86, %c0_87] : memref<4x16x1xf32, #tpu.memory_space<vmem>>, vector<1x16x1xf32>
    %128 = vector.shape_cast %127 : vector<1x16x1xf32> to vector<16x1xf32>
    %cst_88 = arith.constant dense<0xFF800000> : vector<16xf32>
    %129 = vector.multi_reduction <maximumf>, %126, %cst_88 [1] : vector<16x16xf32> to vector<16xf32>
    %130 = vector.shape_cast %129 : vector<16xf32> to vector<16x1xf32>
    %131 = arith.maximumf %128, %130 : vector<16x1xf32>
    %132 = arith.subf %128, %131 : vector<16x1xf32>
    %133 = math.exp %132 : vector<16x1xf32>
    %134 = vector.broadcast %131 : vector<16x1xf32> to vector<16x16xf32>
    %135 = arith.subf %126, %134 : vector<16x16xf32>
    %136 = math.exp %135 : vector<16x16xf32>
    %c3_89 = arith.constant 3 : index
    %c0_90 = arith.constant 0 : index
    %c0_91 = arith.constant 0 : index
    %137 = vector.load %arg11[%c3_89, %c0_90, %c0_91] : memref<4x16x1xf32, #tpu.memory_space<vmem>>, vector<1x16x1xf32>
    %138 = vector.shape_cast %137 : vector<1x16x1xf32> to vector<16x1xf32>
    %139 = arith.mulf %133, %138 : vector<16x1xf32>
    %cst_92 = arith.constant dense<0.000000e+00> : vector<16xf32>
    %140 = vector.multi_reduction <add>, %136, %cst_92 [1] : vector<16x16xf32> to vector<16xf32>
    %141 = vector.shape_cast %140 : vector<16xf32> to vector<16x1xf32>
    %142 = arith.addf %139, %141 : vector<16x1xf32>
    %c3_93 = arith.constant 3 : index
    %c0_94 = arith.constant 0 : index
    %c0_95 = arith.constant 0 : index
    %143 = vector.load %arg11[%c3_93, %c0_94, %c0_95] : memref<4x16x1xf32, #tpu.memory_space<vmem>>, vector<1x16x1xf32>
    %144 = vector.shape_cast %143 : vector<1x16x1xf32> to vector<16x1xf32>
    %145 = vector.shape_cast %142 : vector<16x1xf32> to vector<1x16x1xf32>
    tpu.vector_store %arg11[%c3_93, %c0_94, %c0_95], %145 {strides = array<i32>} : memref<4x16x1xf32, #tpu.memory_space<vmem>>, vector<1x16x1xf32>,
    %c3_96 = arith.constant 3 : index
    %c0_97 = arith.constant 0 : index
    %c0_98 = arith.constant 0 : index
    %146 = vector.load %arg12[%c3_96, %c0_97, %c0_98] : memref<4x16x8xf32, #tpu.memory_space<vmem>>, vector<1x16x8xf32>
    %147 = vector.shape_cast %146 : vector<1x16x8xf32> to vector<16x8xf32>
    %148 = vector.broadcast %133 : vector<16x1xf32> to vector<16x8xf32>
    %149 = arith.mulf %148, %147 : vector<16x8xf32>
    %150 = arith.truncf %136 : vector<16x16xf32> to vector<16x16xbf16>
    %cst_99 = arith.constant dense<0.000000e+00> : vector<16x8xf32>
    %151 = tpu.matmul %150, %123, %cst_99 {dimension_numbers = #tpu.dot_dimension_numbers<[1], [0], [0], [1], [0, 0, 1, 1], [], []>} : vector<16x16xbf16>, vector<16x8xbf16>, vector<16x8xf32> -> vector<16x8xf32>
    %152 = arith.addf %149, %151 : vector<16x8xf32>
    %c3_100 = arith.constant 3 : index
    %c0_101 = arith.constant 0 : index
    %c0_102 = arith.constant 0 : index
    %153 = vector.load %arg12[%c3_100, %c0_101, %c0_102] : memref<4x16x8xf32, #tpu.memory_space<vmem>>, vector<1x16x8xf32>
    %154 = vector.shape_cast %153 : vector<1x16x8xf32> to vector<16x8xf32>
    %155 = vector.shape_cast %152 : vector<16x8xf32> to vector<1x16x8xf32>
    tpu.vector_store %arg12[%c3_100, %c0_101, %c0_102], %155 {strides = array<i32>} : memref<4x16x8xf32, #tpu.memory_space<vmem>>, vector<1x16x8xf32>,
    %c3_103 = arith.constant 3 : index
    %c0_104 = arith.constant 0 : index
    %c0_105 = arith.constant 0 : index
    %156 = vector.load %arg10[%c3_103, %c0_104, %c0_105] : memref<4x16x1xf32, #tpu.memory_space<vmem>>, vector<1x16x1xf32>
    %157 = vector.shape_cast %156 : vector<1x16x1xf32> to vector<16x1xf32>
    %158 = vector.shape_cast %131 : vector<16x1xf32> to vector<1x16x1xf32>
    tpu.vector_store %arg10[%c3_103, %c0_104, %c0_105], %158 {strides = array<i32>} : memref<4x16x1xf32, #tpu.memory_space<vmem>>, vector<1x16x1xf32>,
    %c0_i32_106 = arith.constant 0 : i32
    %159 = arith.cmpi eq, %arg2, %c0_i32_106 : i32
    %160 = arith.extui %159 : i1 to i32
    %c0_i32_107 = arith.constant 0 : i32
    %161 = arith.cmpi ne, %160, %c0_i32_107 : i32
    scf.if %161 {
      %c0_108 = arith.constant 0 : index
      %c0_109 = arith.constant 0 : index
      %c0_110 = arith.constant 0 : index
      %162 = vector.load %arg11[%c0_108, %c0_109, %c0_110] : memref<4x16x1xf32, #tpu.memory_space<vmem>>, vector<1x16x1xf32>
      %163 = vector.shape_cast %162 : vector<1x16x1xf32> to vector<16x1xf32>
      %164 = tpu.reciprocal %163 {approx = true} : vector<16x1xf32> -> vector<16x1xf32>
      %c0_111 = arith.constant 0 : index
      %c0_112 = arith.constant 0 : index
      %c0_113 = arith.constant 0 : index
      %165 = vector.load %arg12[%c0_111, %c0_112, %c0_113] : memref<4x16x8xf32, #tpu.memory_space<vmem>>, vector<1x16x8xf32>
      %166 = vector.shape_cast %165 : vector<1x16x8xf32> to vector<16x8xf32>
      %167 = vector.broadcast %164 : vector<16x1xf32> to vector<16x8xf32>
      %168 = arith.mulf %166, %167 : vector<16x8xf32>
      %c1_114 = arith.constant 1 : index
      %c0_115 = arith.constant 0 : index
      %c0_116 = arith.constant 0 : index
      %169 = vector.load %arg11[%c1_114, %c0_115, %c0_116] : memref<4x16x1xf32, #tpu.memory_space<vmem>>, vector<1x16x1xf32>
      %170 = vector.shape_cast %169 : vector<1x16x1xf32> to vector<16x1xf32>
      %171 = tpu.reciprocal %170 {approx = true} : vector<16x1xf32> -> vector<16x1xf32>
      %c1_117 = arith.constant 1 : index
      %c0_118 = arith.constant 0 : index
      %c0_119 = arith.constant 0 : index
      %172 = vector.load %arg12[%c1_117, %c0_118, %c0_119] : memref<4x16x8xf32, #tpu.memory_space<vmem>>, vector<1x16x8xf32>
      %173 = vector.shape_cast %172 : vector<1x16x8xf32> to vector<16x8xf32>
      %174 = vector.broadcast %171 : vector<16x1xf32> to vector<16x8xf32>
      %175 = arith.mulf %173, %174 : vector<16x8xf32>
      %c2_120 = arith.constant 2 : index
      %c0_121 = arith.constant 0 : index
      %c0_122 = arith.constant 0 : index
      %176 = vector.load %arg11[%c2_120, %c0_121, %c0_122] : memref<4x16x1xf32, #tpu.memory_space<vmem>>, vector<1x16x1xf32>
      %177 = vector.shape_cast %176 : vector<1x16x1xf32> to vector<16x1xf32>
      %178 = tpu.reciprocal %177 {approx = true} : vector<16x1xf32> -> vector<16x1xf32>
      %c2_123 = arith.constant 2 : index
      %c0_124 = arith.constant 0 : index
      %c0_125 = arith.constant 0 : index
      %179 = vector.load %arg12[%c2_123, %c0_124, %c0_125] : memref<4x16x8xf32, #tpu.memory_space<vmem>>, vector<1x16x8xf32>
      %180 = vector.shape_cast %179 : vector<1x16x8xf32> to vector<16x8xf32>
      %181 = vector.broadcast %178 : vector<16x1xf32> to vector<16x8xf32>
      %182 = arith.mulf %180, %181 : vector<16x8xf32>
      %c3_126 = arith.constant 3 : index
      %c0_127 = arith.constant 0 : index
      %c0_128 = arith.constant 0 : index
      %183 = vector.load %arg11[%c3_126, %c0_127, %c0_128] : memref<4x16x1xf32, #tpu.memory_space<vmem>>, vector<1x16x1xf32>
      %184 = vector.shape_cast %183 : vector<1x16x1xf32> to vector<16x1xf32>
      %185 = tpu.reciprocal %184 {approx = true} : vector<16x1xf32> -> vector<16x1xf32>
      %c3_129 = arith.constant 3 : index
      %c0_130 = arith.constant 0 : index
      %c0_131 = arith.constant 0 : index
      %186 = vector.load %arg12[%c3_129, %c0_130, %c0_131] : memref<4x16x8xf32, #tpu.memory_space<vmem>>, vector<1x16x8xf32>
      %187 = vector.shape_cast %186 : vector<1x16x8xf32> to vector<16x8xf32>
      %188 = vector.broadcast %185 : vector<16x1xf32> to vector<16x8xf32>
      %189 = arith.mulf %187, %188 : vector<16x8xf32>
      %190 = tpu.concatenate %168, %175, %182, %189 in 1 : vector<16x8xf32>, vector<16x8xf32>, vector<16x8xf32>, vector<16x8xf32> -> vector<16x32xf32>
      %c0_132 = arith.constant 0 : index
      %c0_133 = arith.constant 0 : index
      %c0_134 = arith.constant 0 : index
      %191 = vector.load %arg8[%c0_132, %c0_133, %c0_134] : memref<1x16x32xf32, #tpu.memory_space<vmem>>, vector<1x16x32xf32>
      %192 = vector.shape_cast %191 : vector<1x16x32xf32> to vector<16x32xf32>
      %193 = vector.shape_cast %190 : vector<16x32xf32> to vector<1x16x32xf32>
      tpu.vector_store %arg8[%c0_132, %c0_133, %c0_134], %193 {strides = array<i32>} : memref<1x16x32xf32, #tpu.memory_space<vmem>>, vector<1x16x32xf32>,
    } else {
    }
    return
  }
  func.func @transform_0(%arg0: i32, %arg1: i32, %arg2: i32) -> (i32, i32, i32) {
    %c0_i32 = arith.constant 0 : i32
    %c0_i32_0 = arith.constant 0 : i32
    return %arg0, %arg1, %c0_i32 : i32, i32, i32
  }
  func.func @transform_1(%arg0: i32, %arg1: i32, %arg2: i32) -> (i32, i32, i32) {
    %c0_i32 = arith.constant 0 : i32
    %c0_i32_0 = arith.constant 0 : i32
    return %arg0, %arg2, %c0_i32 : i32, i32, i32
  }
  func.func @transform_2(%arg0: i32, %arg1: i32, %arg2: i32) -> (i32, i32) {
    %c0_i32 = arith.constant 0 : i32
    %c0_i32_0 = arith.constant 0 : i32
    %c0_i32_1 = arith.constant 0 : i32
    return %c0_i32, %c0_i32_0 : i32, i32
  }
  func.func @transform_3(%arg0: i32, %arg1: i32, %arg2: i32) -> (i32, i32) {
    %c0_i32 = arith.constant 0 : i32
    %c0_i32_0 = arith.constant 0 : i32
    %c0_i32_1 = arith.constant 0 : i32
    return %c0_i32, %c0_i32_0 : i32, i32
  }
  func.func @transform_4(%arg0: i32, %arg1: i32, %arg2: i32) -> (i32, i32) {
    %c0_i32 = arith.constant 0 : i32
    %c0_i32_0 = arith.constant 0 : i32
    %c0_i32_1 = arith.constant 0 : i32
    return %c0_i32, %c0_i32_0 : i32, i32
  }
  func.func @transform_5(%arg0: i32, %arg1: i32, %arg2: i32) -> (i32, i32, i32) {
    %c0_i32 = arith.constant 0 : i32
    %c0_i32_0 = arith.constant 0 : i32
    return %arg0, %arg1, %c0_i32 : i32, i32, i32
  }
}

</mosaic_0001>

<bundles_post_ra>
// kernel: tpu_custom_call.1
= control target key start
LH: loop header
LB: loop body
LE: loop exit
PB: predicated region body
PF: predicated region fallthrough
CT: control target
= control target key end

     0   :  { %s2757_s0 = inlined_call_operand.hbm [shape: bf16[2,16,32], index: 0, kind: input, shape index: {}]   ;;  %s2758_s1 = inlined_call_operand.hbm [shape: bf16[2,16,32], index: 1, kind: input, shape index: {}]   ;;  %s2759_s2 = inlined_call_operand.hbm [shape: bf16[32,32], index: 2, kind: input, shape index: {}]   ;;  %s2760_s3 = inlined_call_operand.hbm [shape: bf16[32,32], index: 3, kind: input, shape index: {}]   ;;  %s2761_s4 = inlined_call_operand.hbm [shape: bf16[32,32], index: 4, kind: input, shape index: {}]   ;;  %s2762_s5 = inlined_call_operand.hbm [shape: f32[2,16,32], index: 5, kind: output, shape index: {}]  }
   0x1   :  { %2771 = sst [smem:[#allocation22_spill]] %s2757_s0 }
   0x2   :  { %2772 = sst [smem:[#allocation23_spill]] %s2759_s2 }
   0x3   :  { %2773 = sst [smem:[#allocation24_spill]] %s2760_s3 }
   0x4   :  { %10 = vsyncpa [#allocation7], 0 }
   0x5   :  { %12 = vsyncpa [#allocation7 + $0x1], 0 }
   0x6   :  { %13 = vsyncpa [#allocation10], 0 }
   0x7   :  { %15 = vsyncpa [#allocation10 + $0x1], 0 }
   0x8   :  { %16 = vsyncpa [#allocation13], 0 }
   0x9   :  { %17 = vsyncpa [#allocation8], 0 }
   0xa   :  { %19 = vsyncpa [#allocation8 + $0x1], 0  ;;  %s2140_s18 = smov 0   ;;  %s2142_s19 = smov 0  }
   0xb   :  { %s2144_s20 = smov 0   ;;  %s2146_s21 = smov 0  }
   0xc   :  { %s2148_s22 = smov 0   ;;  %s2150_s23 = smov 0  }
   0xd LB: > { %s2171_s24 = sadd.s32 4294967295, %s2089_s23   ;;  %s1539_s25 = sadd.s32 4294967294, %s2089_s23   ;;  %s2089_s23 = sphi %s2150_s23, %s25_s23   ;;  %s2085_s22 = sphi %s2148_s22, %s2801_s22   ;;  %s2081_s21 = sphi %s2146_s21, %s2800_s21   ;;  %s2077_s20 = sphi %s2144_s20, %s2799_s20   ;;  %s2073_s19 = sphi %s2142_s19, %s2798_s19   ;;  %s2069_s18 = sphi %s2140_s18, %s2797_s18  }
   0xe   : > { %p66_p0 = scmp.ne.s32.totalorder %s2073_s19, %s2069_s18  ;;  %p2763_p1 = scmp.eq.s32.totalorder %s2171_s24, 0 }
   0xf   : > { %p189_p3 = scmp.eq.s32.totalorder %s1539_s25, 1  ;;  %p1540_p5 = scmp.ge.s32.totalorder %s2089_s23, 1 }
  0x10   : > { %p2180_p4 = por %p2763_p1, %p66_p0  ;;  %p196_p7 = scmp.lt.s32.totalorder %s2089_s23, 3 }
  0x11   : > { %p2185_p6 = por %p189_p3, %p66_p0  ;;  %s2091_s29 = smov [#allocation11]  }
  0x12   : > { %s2774_s26 = scalar_select %p2180_p4, 1, 0 }
  0x13   : > { %s2775_s27 = scalar_select %p2185_p6, 1, 0 }
  0x14   : > { %p2190_p8 = pnand %p1540_p5, %p196_p7  ;;  %s208_s30 = sshll.u32 %s2091_s29, 4  ;;  %s2194_s30 = int_to_ptr.vmem [resolvable:$true] %s208_s30 }
  0x15   : > { %2776 = sst [smem:[#allocation21_spill]] %s2775_s27  ;;  %s2092_s7 = smov [#allocation12]  }
  0x16   : > { %s2777_s28 = scalar_select %p2190_p8, 1, 0 }
  0x17   : > { %p1700_p9 = pneg %p2190_p8  ;;  %s221_s8 = sshll.u32 %s2092_s7, 4  ;;  %s2205_s8 = int_to_ptr.vmem [resolvable:$true] %s221_s8 }
  0x18   : > { %s2093_s9 = smov [#allocation14]   ;;  %s2779_s2 = sld [smem:[#allocation23_spill]] }
  0x19   : > { %p2201_p11 = pnand %p1700_p9, %p2763_p1  ;;  %s2207_s10 = sshll.u32 %s2093_s9, 4  ;;  %s235_s10 = int_to_ptr.vmem [resolvable:$true] %s2207_s10 }
  0x1b   : > { %p2217_p13 = pneg %p2201_p11 }
  0x1e   : > { %s1851_s13 = scalar_lea.hbm %s2779_s2, 256 }
  0x1f   : > { %p1852_p12 = scmp.ne.s32.totalorder %s2779_s2, %s1851_s13  ;;  %p1858_p5 = scmp.lt.u32.totalorder %s1851_s13, %s2779_s2 }
  0x21   : > { %p1854_p0 = pnand %p2217_p13, %p1852_p12 }
  0x23   : > { %p1855_p3 = pneg %p1854_p0 }
  0x25   : > { %p1860_p7 = pnand %p1858_p5, %p1855_p3 }
  0x27   : > { %1863 = shalt.err (!%p1860_p7)
}
  0x28   : > { %s1864_s29 = scalar_lea.vmem %s2194_s30, 256  ;;  %p1872_p2 = scmp.lt.s32.totalorder %s2194_s30, %s2194_s30 }
  0x29   : > { %p1865_p9 = scmp.ne.s32.totalorder %s2194_s30, %s1864_s29  ;;  %p1873_p6 = scmp.lt.s32.totalorder %s1864_s29, %s1864_s29 }
  0x2b   : > { %p1867_p10 = pnand %p1865_p9, %p2217_p13  ;;  %p1874_p12 = por %p1873_p6, %p1872_p2 }
  0x2d   : > { %p1868_p1 = pneg %p1867_p10 }
  0x2f   : > { %p1875_p0 = pnand %p1874_p12, %p1868_p1 }
  0x31   : > { %1878 = shalt.err (!%p1875_p0)
}
  0x32   : > { %s2767_s7 = smov 64   ;;  %s2769_s9 = smov 4  }
  0x33   : > { %1703 = dma.hbm_to_vmem [thread:$0]  (!%p2201_p11), %s2779_s2, 256, %s2194_s30, [#allocation10], %s2767_s7, %s2767_s7, %s2769_s9  }
  0x34   : > { %s2781_s3 = sld [smem:[#allocation24_spill]] }
  0x3a   : > { %s1879_s15 = scalar_lea.hbm %s2781_s3, 256 }
  0x3b   : > { %p1880_p1 = scmp.ne.s32.totalorder %s2781_s3, %s1879_s15  ;;  %p1886_p10 = scmp.lt.u32.totalorder %s1879_s15, %s2781_s3 }
  0x3d   : > { %p1882_p2 = pnand %p1880_p1, %p2217_p13 }
  0x3f   : > { %p1883_p6 = pneg %p1882_p2 }
  0x41   : > { %p1888_p3 = pnand %p1886_p10, %p1883_p6 }
  0x43   : > { %1891 = shalt.err (!%p1888_p3)
}
  0x44   : > { %s1892_s30 = scalar_lea.vmem %s2205_s8, 256  ;;  %p1900_p12 = scmp.lt.s32.totalorder %s2205_s8, %s2205_s8 }
  0x45   : > { %p1893_p5 = scmp.ne.s32.totalorder %s2205_s8, %s1892_s30  ;;  %p1901_p0 = scmp.lt.s32.totalorder %s1892_s30, %s1892_s30 }
  0x47   : > { %p1895_p7 = pnand %p1893_p5, %p2217_p13  ;;  %p1902_p1 = por %p1901_p0, %p1900_p12 }
  0x49   : > { %p1896_p9 = pneg %p1895_p7 }
  0x4b   : > { %p1903_p2 = pnand %p1902_p1, %p1896_p9 }
  0x4d   : > { %1906 = shalt.err (!%p1903_p2)
}
  0x4e   : > { %1706 = dma.hbm_to_vmem [thread:$0]  (!%p2201_p11), %s2781_s3, 256, %s2205_s8, [#allocation13], %s2767_s7, %s2767_s7, %s2769_s9  }
  0x4f   : > { %s1907_s14 = scalar_lea.hbm %s2761_s4, 256 }
  0x50   : > { %p1908_p6 = scmp.ne.s32.totalorder %s2761_s4, %s1907_s14  ;;  %p1914_p5 = scmp.lt.u32.totalorder %s1907_s14, %s2761_s4 }
  0x52   : > { %p1910_p10 = pnand %p1908_p6, %p2217_p13 }
  0x54   : > { %p1911_p3 = pneg %p1910_p10 }
  0x56   : > { %p1916_p7 = pnand %p1914_p5, %p1911_p3 }
  0x58   : > { %1919 = shalt.err (!%p1916_p7)
}
  0x59   : > { %s1920_s30 = scalar_lea.vmem %s235_s10, 256  ;;  %p1928_p1 = scmp.lt.s32.totalorder %s235_s10, %s235_s10 }
  0x5a   : > { %p1921_p9 = scmp.ne.s32.totalorder %s235_s10, %s1920_s30  ;;  %p1929_p2 = scmp.lt.s32.totalorder %s1920_s30, %s1920_s30 }
  0x5c   : > { %p1923_p12 = pnand %p1921_p9, %p2217_p13  ;;  %p1930_p4 = por %p1929_p2, %p1928_p1 }
  0x5e   : > { %p1924_p0 = pneg %p1923_p12 }
  0x60   : > { %p1931_p8 = pnand %p1930_p4, %p1924_p0 }
  0x62   : > { %1934 = shalt.err (!%p1931_p8)
}
  0x63   : > { %1709 = dma.hbm_to_vmem [thread:$0]  (!%p2201_p11), %s2761_s4, 256, %s235_s10, [#allocation13], %s2767_s7, %s2767_s7, %s2769_s9  }
  0x64   : > { %s53_s16 = sadd.s32 1, %s2077_s20  ;;  %s44_s6 = sadd.s32 1, %s2085_s22 }
  0x65   : > { %p60_p4 = scmp.ne.s32.totalorder %s2077_s20, %s2073_s19  ;;  %p46_p8 = scmp.ge.s32.totalorder %s44_s6, 2 }
  0x66   : > { %p61_p13 = scmp.eq.s32.totalorder %s2089_s23, 0  ;;  %p2782_p6 = scmp.eq.s32.totalorder %s2171_s24, 1 }
  0x67   : > { %p1724_p3 = scmp.lt.s32.totalorder %s2089_s23, 2  ;;  %s2803_s6 = smov (%p46_p8, %s44_s6), 0 }
  0x68   : > { %p2296_p10 = por %p2782_p6, %p60_p4  ;;  %p62_p5 = por %p61_p13, %p60_p4 }
  0x69   : > { %s248_s12 = sand.u32 1, %s2077_s20   ;;  %s48_s13 = ssub.s32 %s2085_s22, %s2803_s6 }
  0x6a   : > { %p51_p7 = scmp.eq.s32.totalorder %s48_s13, 0  ;;  %s1545_s10 = sshll.u32 %s248_s12, 3 }
  0x6b   : > { %s1582_s14 = sshll.u32 %s2085_s22, 7  ;;  %s2784_s0 = sld [smem:[#allocation22_spill]] }
  0x6c   : > { %s2308_s15 = scalar_select %p51_p7, %s2077_s20, %s53_s16  }
  0x6d   : > { %s252_s30 = scalar_lea.vmem [#allocation6], %s1545_s10  ;;  %p2319_p11 = pnand %p1724_p3, %p62_p5 }
  0x6e   : > { %s261_s8 = sshll.u32 %s252_s30, 4  ;;  %s2326_s17 = scalar_lea.hbm %s2758_s1, %s1582_s14  ;;  %s2315_s8 = int_to_ptr.vmem [resolvable:$true] %s261_s8 }
  0x6f   : > { %s275_s25 = scalar_lea.vmem [#allocation9], %s1545_s10  ;;  %s2330_s9 = scalar_lea.sflag [#allocation7], %s248_s12 }
  0x70   : > { %s2328_s7 = sshll.u32 %s275_s25, 4  ;;  %p1937_p12 = pneg %p2319_p11  ;;  %s2362_s7 = int_to_ptr.vmem [resolvable:$true] %s2328_s7 }
  0x71   : > { %s2313_s29 = scalar_lea.hbm %s2784_s0, %s1582_s14  ;;  %s1940_s16 = scalar_lea.hbm %s2784_s0, 256 }
  0x72   : > { %s1935_s30 = scalar_lea.hbm %s2313_s29, 128  ;;  %p1941_p2 = scmp.lt.u32.totalorder %s2313_s29, %s2784_s0 }
  0x73   : > { %p1936_p9 = scmp.ne.s32.totalorder %s2313_s29, %s1935_s30  ;;  %p1942_p4 = scmp.lt.u32.totalorder %s1940_s16, %s1935_s30 }
  0x74   : > { %p1944_p13 = scmp.lt.u32.totalorder %s1935_s30, %s2313_s29 }
  0x75   : > { %p1938_p0 = pnand %p1937_p12, %p1936_p9  ;;  %p1943_p8 = por %p1942_p4, %p1941_p2 }
  0x77   : > { %p1939_p1 = pneg %p1938_p0  ;;  %p1945_p6 = por %p1944_p13, %p1943_p8 }
  0x79   : > { %p1946_p3 = pnand %p1945_p6, %p1939_p1 }
  0x7b   : > { %1949 = shalt.err (!%p1946_p3)
}
  0x7c   : > { %s1950_s12 = scalar_lea.vmem %s2315_s8, 128  ;;  %s2096_s2 = smov [#allocation6]  }
  0x7d   : > { %p1951_p5 = scmp.ne.s32.totalorder %s2315_s8, %s1950_s12  ;;  %s1955_s3 = sshll.u32 %s2096_s2, 4  ;;  %s1956_s3 = int_to_ptr.vmem [resolvable:$false] %s1955_s3 }
  0x7e   : > { %s1957_s10 = scalar_lea.vmem %s1956_s3, 256  ;;  %p1958_p0 = scmp.lt.s32.totalorder %s2315_s8, %s1956_s3 }
  0x7f   : > { %p1953_p7 = pnand %p1951_p5, %p1937_p12  ;;  %p1959_p2 = scmp.lt.s32.totalorder %s1957_s10, %s1950_s12 }
  0x81   : > { %p1954_p9 = pneg %p1953_p7  ;;  %p1960_p4 = por %p1959_p2, %p1958_p0 }
  0x83   : > { %p1961_p8 = pnand %p1960_p4, %p1954_p9 }
  0x85   : > { %1964 = shalt.err (!%p1961_p8)
}
  0x86   : > { %s2786_s25 = smov 4   ;;  %s2787_s30 = smov 64  }
  0x87   : > { %1713 = dma.hbm_to_vmem [thread:$0]  (!%p2319_p11), %s2313_s29, 128, %s2315_s8, %s2330_s9, %s2787_s30, %s2787_s30, %s2786_s25  }
  0x88   : > { %s271_s16 = sand.u32 1, %s2089_s23   ;;  %s1965_s14 = scalar_lea.hbm %s2326_s17, 128 }
  0x89   : > { %s2365_s13 = scalar_lea.sflag [#allocation10], %s271_s16  ;;  %p1966_p1 = scmp.ne.s32.totalorder %s2326_s17, %s1965_s14 }
  0x8a   : > { %s1970_s3 = scalar_lea.hbm %s2758_s1, 256  ;;  %p1971_p3 = scmp.lt.u32.totalorder %s2326_s17, %s2758_s1 }
  0x8b   : > { %p1968_p13 = pnand %p1966_p1, %p1937_p12  ;;  %p1972_p5 = scmp.lt.u32.totalorder %s1970_s3, %s1965_s14 }
  0x8c   : > { %p1974_p9 = scmp.lt.u32.totalorder %s1965_s14, %s2326_s17 }
  0x8d   : > { %p1969_p6 = pneg %p1968_p13  ;;  %p1973_p7 = por %p1972_p5, %p1971_p3 }
  0x8f   : > { %p1975_p0 = por %p1974_p9, %p1973_p7 }
  0x91   : > { %p1976_p2 = pnand %p1975_p0, %p1969_p6 }
  0x93   : > { %1979 = shalt.err (!%p1976_p2)
}
  0x94   : > { %s1980_s9 = scalar_lea.vmem %s2362_s7, 128  ;;  %s2097_s29 = smov [#allocation9]  }
  0x95   : > { %p1981_p4 = scmp.ne.s32.totalorder %s2362_s7, %s1980_s9  ;;  %s1985_s8 = sshll.u32 %s2097_s29, 4  ;;  %s1986_s8 = int_to_ptr.vmem [resolvable:$false] %s1985_s8 }
  0x96   : > { %s1987_s0 = scalar_lea.vmem %s1986_s8, 256  ;;  %p1988_p13 = scmp.lt.s32.totalorder %s2362_s7, %s1986_s8 }
  0x97   : > { %p1983_p8 = pnand %p1981_p4, %p1937_p12  ;;  %p1989_p3 = scmp.lt.s32.totalorder %s1987_s0, %s1980_s9 }
  0x99   : > { %p1984_p1 = pneg %p1983_p8  ;;  %p1990_p5 = por %p1989_p3, %p1988_p13 }
  0x9b   : > { %p1991_p7 = pnand %p1990_p5, %p1984_p1 }
  0x9d   : > { %1994 = shalt.err (!%p1991_p7)
}
  0x9e   : > { %1716 = dma.hbm_to_vmem [thread:$0]  (!%p2319_p11), %s2326_s17, 128, %s2362_s7, %s2365_s13, %s2787_s30, %s2787_s30, %s2786_s25  }
  0x9f   : > { %p2788_p12 = scmp.ne.s32.totalorder %s2777_s28, 0 }
  0xa0   : > { %s2397_s16 = sand.u32 (!%p2788_p12), 1, %s2073_s19   ;;  %p2789_p6 = scmp.ne.s32.totalorder (!%p2788_p12), %s2774_s26, 0 }
  0xa1   : > { %296 = sbr.rel (%p2788_p12) target bundleno = 1477 (0x5c5), region = 40  ;;  %s1552_s14 = sshll.u32 (!%p2788_p12), %s2397_s16, 3 }
  0xa2   : > { %s299_s12 = scalar_lea.sflag (!%p2788_p12), [#allocation7], %s2397_s16  ;;  %s302_s2 = scalar_lea.vmem (!%p2788_p12), [#allocation6], %s1552_s14 }
  0xa8   : > { %2048 = dma.done.wait (%p2789_p6), %s299_s12, 128  }
  0xa9   : > { %2050 = vsyncadd (%p2789_p6), %s299_s12, 4294967168  ;;  %s307_s7 = sand.u32 1, %s2171_s24   ;;  %s311_s28 = scalar_lea.vmem [#allocation9], %s1552_s14 }
  0xaa   : > { %s308_s27 = scalar_lea.sflag [#allocation10], %s307_s7 }
  0xab   : > { %2052 = dma.done.wait (%p2789_p6), %s308_s27, 128  }
  0xac   : > { %2054 = vsyncadd (%p2789_p6), %s308_s27, 4294967168  ;;  %p2790_p11 = scmp.eq.s32.totalorder %s2171_s24, 0 }
  0xae   : > { %2056 = dma.done.wait (%p2790_p11), [#allocation10], 256   ;;  %p2791_p9 = pmov %p2790_p11 }
  0xb0   : > { %2058 = vsyncadd (%p2791_p9), [#allocation10], 4294967040  ;;  %p2792_p0 = pmov %p2791_p9 }
  0xb2   : > { %2060 = dma.done.wait (%p2792_p0), [#allocation13], 512   ;;  %p2793_p2 = pmov %p2792_p0 }
  0xb3   : > { %v2098_v0 = vmov 0.0   ;;  %vm2099_vm0 = vmmov 0   ;;  %v1795_v1 = vld [vmem:[#allocation11] sm:$0xff]   ;;  %v1796_v2 = vld [vmem:[#allocation12] sm:$0xff]   ;;  %v1797_v3 = vld [vmem:[#allocation11 + $0x8] sm:$0xff]   ;;  %vm386_vm1 = vcmask 261120  }
  0xb4   : > { %2062 = vsyncadd (%p2793_p2), [#allocation13], 4294966784  ;;  %1610 = vmatprep.subr.bf16.mxu0 %v2098_v0  ;;  %1618 = vmatprep.subr.bf16.mxu1 %v2098_v0  ;;  %v1798_v4 = vld [vmem:[#allocation12 + $0x8] sm:$0xff]   ;;  %v1799_v5 = vld [vmem:[%s302_s2] sm:$0xff]   ;;  %vm432_vm2 = vcmask 64512   ;;  %s2100_s24 = smov 112  }
  0xb5   : > { %1614 = vmatprep.mubr.msk.bf16.mxu0 %vm2099_vm0, %v2098_v0  ;;  %1622 = vmatprep.mubr.msk.bf16.mxu1 %vm2099_vm0, %v2098_v0  ;;  %v1800_v6 = vld [vmem:[%s311_s28] sm:$0xff]   ;;  %467 = vst.msk [vmem:[#allocation5] sm:$0xff] %vm432_vm2, %v2098_v0  ;;  %468 = vst.msk [vmem:[#allocation5 + $0x8] sm:$0xff] %vm432_vm2, %v2098_v0  ;;  %s2101_s26 = smov 120   ;;  %s2102_s17 = smov 104   ;;  %v1801_v19 = vld [vmem:[#allocation14] sm:$0xff]  }
  0xb6   : > { %1611 = vmatpush3.bf16.msra.mxu0 %v1795_v1  ;;  %1619 = vmatpush3.bf16.msra.mxu1 %v1796_v2  ;;  %469 = vst.msk [vmem:[#allocation5 + $0x10] sm:$0xff] %vm432_vm2, %v2098_v0  ;;  %470 = vst.msk [vmem:[#allocation5 + $0x18] sm:$0xff] %vm432_vm2, %v2098_v0  ;;  %v1802_v20 = vld [vmem:[#allocation14 + $0x8] sm:$0xff]   ;;  %vm653_vm3 = vcmask 130048   ;;  %vm450_vm4 = vcmask 7168   ;;  %v2104_v40 = vmov 0  }
  0xb7   : > { %1612 = vmatprep.subr.bf16.mxu0 %v2098_v0  ;;  %1620 = vmatprep.subr.bf16.mxu1 %v2098_v0  ;;  %471 = vst.msk [vmem:[#allocation5 + $0x20] sm:$0xff] %vm432_vm2, %v2098_v0  ;;  %472 = vst.msk [vmem:[#allocation5 + $0x28] sm:$0xff] %vm432_vm2, %v2098_v0  ;;  %v2103_v39 = vmov -1e+30   ;;  %s2105_s25 = smov 8   ;;  %s2106_s30 = smov 16  }
  0xb8   : > { %473 = vst.msk [vmem:[#allocation5 + $0x30] sm:$0xff] %vm432_vm2, %v2098_v0  ;;  %474 = vst.msk [vmem:[#allocation5 + $0x38] sm:$0xff] %vm432_vm2, %v2098_v0  ;;  %1793 = vset.pattern.permute.xlu1 %v2104_v40  ;;  %1794 = vset.pattern.permute.xlu0 %v2104_v40  ;;  %s2107_s13 = smov 24   ;;  %s1557_s3 = sshll.u32 %s2397_s16, 4  ;;  %vm1373_vm5 = vcmask 195584  }
  0xb9   : > { %451 = vst.msk [vmem:[#allocation3] sm:$0xff] %vm450_vm4, %v2103_v39  ;;  %452 = vst.msk [vmem:[#allocation3 + $0x8] sm:$0xff] %vm450_vm4, %v2103_v39  ;;  %s354_s10 = scalar_lea.vmem [#allocation15], %s1557_s3  ;;  %s1584_s29 = sshll.u32 %s2081_s21, 8 }
  0xba   : > { %1613 = vmatpush3.bf16.msra.mxu0 %v1797_v3  ;;  %1621 = vmatpush3.bf16.msra.mxu1 %v1798_v4  ;;  %453 = vst.msk [vmem:[#allocation3 + $0x10] sm:$0xff] %vm450_vm4, %v2103_v39  ;;  %454 = vst.msk [vmem:[#allocation3 + $0x18] sm:$0xff] %vm450_vm4, %v2103_v39  ;;  %s1394_s9 = sshll.u32 %s354_s10, 4  ;;  %s2705_s14 = scalar_lea.hbm %s2762_s5, %s1584_s29  ;;  %s2699_s9 = int_to_ptr.vmem [resolvable:$true] %s1394_s9 }
  0xbb   : > { %1626 = vmatprep.subr.bf16.mxu0 %v2098_v0  ;;  %1634 = vmatprep.subr.bf16.mxu1 %v2098_v0  ;;  %455 = vst.msk [vmem:[#allocation3 + $0x20] sm:$0xff] %vm450_vm4, %v2103_v39  ;;  %456 = vst.msk [vmem:[#allocation3 + $0x28] sm:$0xff] %vm450_vm4, %v2103_v39  ;;  %s1379_s21 = scalar_lea.sflag [#allocation8], %s2397_s16  ;;  %s1995_s12 = scalar_lea.vmem %s2699_s9, 256 }
  0xbc   : > { %457 = vst.msk [vmem:[#allocation3 + $0x30] sm:$0xff] %vm450_vm4, %v2103_v39  ;;  %458 = vst.msk [vmem:[#allocation3 + $0x38] sm:$0xff] %vm450_vm4, %v2103_v39  ;;  %p1996_p4 = scmp.ne.s32.totalorder %s2699_s9, %s1995_s12  ;;  %s2108_s2 = smov [#allocation15]  }
  0xbd   : > { %1615 = vmatmul.mubr.msk.bf16.vlgmr.msra.gmra.mrb[0].mxu0 %vm386_vm1, %v1799_v5  ;;  %1623 = vmatmul.mubr.msk.bf16.vlgmr.msra.gmra.mrb[0].mxu1 %vm386_vm1, %v1800_v6  ;;  %459 = vst.msk [vmem:[#allocation4] sm:$0xff] %vm450_vm4, %v2098_v0  ;;  %460 = vst.msk [vmem:[#allocation4 + $0x8] sm:$0xff] %vm450_vm4, %v2098_v0  ;;  %s1999_s7 = sshll.u32 %s2108_s2, 4  ;;  %s2000_s7 = int_to_ptr.vmem [resolvable:$false] %s1999_s7 }
  0xbe   : > { %1630 = vmatprep.mubr.msk.bf16.mxu0 %vm2099_vm0, %v2098_v0  ;;  %1636 = vmatprep.mubr.msk.bf16.mxu1 %vm2099_vm0, %v2098_v0  ;;  %461 = vst.msk [vmem:[#allocation4 + $0x10] sm:$0xff] %vm450_vm4, %v2098_v0  ;;  %462 = vst.msk [vmem:[#allocation4 + $0x18] sm:$0xff] %vm450_vm4, %v2098_v0  ;;  %p1997_p8 = pnand %p1996_p4, %p2296_p10  ;;  %s2001_s27 = scalar_lea.vmem %s2000_s7, 512 }
  0xbf   : > { %1627 = vmatpush3.bf16.msra.mxu0 %v1801_v19  ;;  %463 = vst.msk [vmem:[#allocation4 + $0x20] sm:$0xff] %vm450_vm4, %v2098_v0  ;;  %464 = vst.msk [vmem:[#allocation4 + $0x28] sm:$0xff] %vm450_vm4, %v2098_v0  ;;  %p2002_p13 = scmp.lt.s32.totalorder %s2699_s9, %s2000_s7  ;;  %p2003_p3 = scmp.lt.s32.totalorder %s2001_s27, %s1995_s12 }
  0xc0   : > { %1628 = vmatprep.subr.bf16.mxu0 %v2098_v0  ;;  %465 = vst.msk [vmem:[#allocation4 + $0x30] sm:$0xff] %vm450_vm4, %v2098_v0  ;;  %466 = vst.msk [vmem:[#allocation4 + $0x38] sm:$0xff] %vm450_vm4, %v2098_v0  ;;  %v2538_v59 = vld [vmem:[#allocation3] sm:$0xff]  ;;  %v2540_v63 = vld [vmem:[#allocation3 + $0x8] sm:$0xff]  ;;  %p1998_p1 = pneg %p1997_p8 }
  0xc1   : > { %p2004_p5 = por %p2003_p3, %p2002_p13 }
  0xc2   : > { %v2582_v19 = vld [vmem:[#allocation3 + $0x28] sm:$0xff] }
  0xc3   : > { %1629 = vmatpush3.bf16.msra.mxu0 %v1802_v20  ;;  %p2005_p7 = pnand %p2004_p5, %p1998_p1 }
  0xc4   : > { %1640 = vmatprep.subr.bf16.mxu0 %v2098_v0 }
  0xc6   : > { %1631 = vmatmul.mubr.msk.bf16.vlgmr.msra.gmra.mrb[4].mxu0 %vm386_vm1, %v1800_v6 }
  0xc7   : > { %1642 = vmatprep.mubr.msk.bf16.mxu0 %vm2099_vm0, %v2098_v0 }
 0x190   : > { %v424_v7 = vpop.f32.mrb[0].mxu0  ;;  %v536_v8 = vpop.f32.mrb[0].mxu1 }
 0x191   : > { %v1616_v9 = vpop.f32.mrb[1].mxu0  ;;  %v1624_v10 = vpop.f32.mrb[1].mxu1 }
 0x192   : > { %v427_v11 = vpop.f32.mrb[2].mxu0  ;;  %v539_v13 = vpop.f32.mrb[2].mxu1  ;;  %v2560_v9 = vld [vmem:[#allocation3 + $0x10] sm:$0xff] }
 0x193   : > { %v431_v12 = vpack.c.bf16 %v427_v11, %v424_v7  ;;  %v1617_v14 = vpop.f32.mrb[3].mxu0  ;;  %v543_v15 = vpack.c.bf16 %v539_v13, %v536_v8  ;;  %v1625_v16 = vpop.f32.mrb[3].mxu1 }
 0x194   : > { %v2575_v16 = vld [vmem:[#allocation3 + $0x20] sm:$0xff] }
 0x195   : > { %433 = vst.msk [vmem:[#allocation2] sm:$0xff] %vm432_vm2, %v431_v12  ;;  %440 = vrot.lane.b32.xlu1 %v431_v12, %s2100_s24  ;;  %435 = vrot.lane.b32.xlu0 %v431_v12, %s2101_s26  ;;  %v608_v17 = vsel %vm432_vm2, %v543_v15, 0 }
 0x196   : > { %1635 = vmatpush3.bf16.xpose.msra.mxu1 %v608_v17 }
 0x197   : > { %1646 = vmatprep.subr.bf16.mxu1 %v2098_v0 }
 0x199   : > { %936 = vrot.lane.b32.xlu1 %v543_v15, %s2100_s24  ;;  %767 = vrot.lane.b32.xlu0 %v543_v15, %s2101_s26  ;;  %v594_v60 = vpop.f32.mrb[4].mxu0 }
 0x19a   : > { %v1632_v61 = vpop.f32.mrb[5].mxu0 }
 0x19b   : > { %v597_v1 = vpop.f32.mrb[6].mxu0 }
 0x19c   : > { %v602_v18 = vld [vmem:[#allocation2] sm:$0xff]  ;;  %v601_v3 = vpack.c.bf16 %v597_v1, %v594_v60  ;;  %v1633_v4 = vpop.f32.mrb[7].mxu0 }
 0x19d   : > { %1104 = vrot.lane.b32.xlu1 %v543_v15, %s2102_s17  ;;  %445 = vrot.lane.b32.xlu0 %v431_v12, %s2102_s17  ;;  %v2565_v12 = vld [vmem:[#allocation3 + $0x18] sm:$0xff] }
 0x19e   : > { %1637 = vmatmul.mubr.msk.bf16.vlgmr.msra.gmra.mrb[4].mxu1 %vm432_vm2, %v602_v18  ;;  %1641 = vmatpush3.bf16.msra.mxu0 %v601_v3 }
 0x19f   : > { %1648 = vmatprep.mubr.msk.bf16.mxu1 %vm2099_vm0, %v2098_v0  ;;  %1652 = vmatprep.subr.bf16.mxu0 %v2098_v0 }
 0x207   : > { %v441_v21 = vpop.permute.xlu1 %440  ;;  %v436_v22 = vpop.permute.xlu0 %435 }
 0x208   : > { %444 = vst.msk [vmem:[#allocation2 + $0x10] sm:$0xff] %vm432_vm2, %v441_v21  ;;  %439 = vst.msk [vmem:[#allocation2 + $0x8] sm:$0xff] %vm432_vm2, %v436_v22 }
 0x20b   : > { %v768_v23 = vpop.permute.xlu0 %767  ;;  %v937_v26 = vpop.permute.xlu1 %936 }
 0x20c   : > { %v773_v24 = vsel %vm432_vm2, %v768_v23, 0  ;;  %v942_v28 = vsel %vm432_vm2, %v937_v26, 0 }
 0x20d   : > { %1647 = vmatpush3.bf16.xpose.msra.mxu1 %v773_v24 }
 0x20e   : > { %1658 = vmatprep.subr.bf16.mxu1 %v2098_v0 }
 0x20f   : > { %v446_v25 = vpop.permute.xlu0 %445  ;;  %v765_v27 = vld [vmem:[#allocation2 + $0x8] sm:$0xff]  ;;  %v1105_v29 = vpop.permute.xlu1 %1104  ;;  %v935_v30 = vld [vmem:[#allocation2 + $0x10] sm:$0xff] }
 0x210   : > { %449 = vst.msk [vmem:[#allocation2 + $0x18] sm:$0xff] %vm432_vm2, %v446_v25  ;;  %v1110_v31 = vsel %vm432_vm2, %v1105_v29, 0  ;;  %v2599_v25 = vld [vmem:[#allocation3 + $0x30] sm:$0xff] }
 0x214   : > { %1649 = vmatmul.mubr.msk.bf16.vlgmr.msra.gmra.mrb[8].mxu1 %vm432_vm2, %v765_v27  ;;  %v2602_v27 = vld [vmem:[#allocation3 + $0x38] sm:$0xff] }
 0x215   : > { %1659 = vmatpush3.bf16.xpose.msra.mxu1 %v942_v28  ;;  %1660 = vmatprep.mubr.msk.bf16.mxu1 %vm2099_vm0, %v2098_v0 }
 0x216   : > { %1670 = vmatprep.subr.bf16.mxu1 %v2098_v0 }
 0x217   : > { %v1103_v32 = vld [vmem:[#allocation2 + $0x18] sm:$0xff] }
 0x21c   : > { %1661 = vmatmul.mubr.msk.bf16.vlgmr.msra.gmra.mrb[12].mxu1 %vm432_vm2, %v935_v30 }
 0x21d   : > { %1671 = vmatpush3.bf16.xpose.msra.mxu1 %v1110_v31  ;;  %1672 = vmatprep.mubr.msk.bf16.mxu1 %vm2099_vm0, %v2098_v0 }
 0x224   : > { %1673 = vmatmul.mubr.msk.bf16.vlgmr.msra.gmra.mrb[16].mxu1 %vm432_vm2, %v1103_v32 }
 0x271   : > { %v2482_v33 = vpop.f32.mrb[4].mxu1 }
 0x272   : > { %v1638_v34 = vpop.f32.mrb[5].mxu1  ;;  %v654_v35 = vsel %vm653_vm3, %v2482_v33, -inf }
 0x273   : > { %655 = vmax.xlane.f32.xlu0 %v654_v35  ;;  %v2486_v36 = vpop.f32.mrb[6].mxu1 }
 0x274   : > { %v1639_v37 = vpop.f32.mrb[7].mxu1  ;;  %v657_v38 = vsel %vm653_vm3, %v2486_v36, -inf }
 0x275   : > { %658 = vmax.xlane.f32.xlu1 %v657_v38 }
 0x2e7   : > { %v2514_v41 = vpop.f32.mrb[8].mxu1 }
 0x2e8   : > { %v1650_v42 = vpop.f32.mrb[9].mxu1  ;;  %v819_v43 = vsel %vm653_vm3, %v2514_v41, -inf }
 0x2e9   : > { %820 = vmax.xlane.f32.xlu0 %v819_v43  ;;  %v2518_v44 = vpop.f32.mrb[10].mxu1 }
 0x2ea   : > { %v1651_v45 = vpop.f32.mrb[11].mxu1  ;;  %v822_v46 = vsel %vm653_vm3, %v2518_v44, -inf }
 0x2ed   : > { %823 = vmax.xlane.f32.xlu0 %v822_v46 }
 0x2ef   : > { %v2522_v47 = vpop.f32.mrb[12].mxu1 }
 0x2f0   : > { %v1662_v48 = vpop.f32.mrb[13].mxu1  ;;  %v988_v49 = vsel %vm653_vm3, %v2522_v47, -inf }
 0x2f1   : > { %989 = vmax.xlane.f32.xlu1 %v988_v49  ;;  %v2526_v50 = vpop.f32.mrb[14].mxu1 }
 0x2f2   : > { %v1663_v51 = vpop.f32.mrb[15].mxu1  ;;  %v991_v52 = vsel %vm653_vm3, %v2526_v50, -inf }
 0x2f3   : > { %992 = vmax.xlane.f32.xlu0 %v991_v52 }
 0x2f7   : > { %v2530_v53 = vpop.f32.mrb[16].mxu1 }
 0x2f8   : > { %v1674_v54 = vpop.f32.mrb[17].mxu1  ;;  %v1156_v55 = vsel %vm653_vm3, %v2530_v53, -inf }
 0x2f9   : > { %1157 = vmax.xlane.f32.xlu1 %v1156_v55  ;;  %v2534_v56 = vpop.f32.mrb[18].mxu1 }
 0x2fa   : > { %v1675_v57 = vpop.f32.mrb[19].mxu1  ;;  %v1159_v58 = vsel %vm653_vm3, %v2534_v56, -inf }
 0x2fb   : > { %1160 = vmax.xlane.f32.xlu0 %v1159_v58 }
 0x300   : > { %v656_v62 = vpop.xlane.xlu0 %655 }
 0x301   : > { %v2543_v2 = vmax.f32 %v2538_v59, %v656_v62 }
 0x302   : > { %v659_v5 = vpop.xlane.xlu1 %658 }
 0x303   : > { %v662_v6 = vsub.f32 %v2538_v59, %v2543_v2  ;;  %762 = vst.msk [vmem:[#allocation3] sm:$0xff] %vm450_vm4, %v2543_v2  ;;  %v2550_v7 = vmax.f32 %v2540_v63, %v659_v5 }
 0x305   : > { %v663_v8 = vsub.f32 %v2540_v63, %v2550_v7  ;;  %763 = vst.msk [vmem:[#allocation3 + $0x8] sm:$0xff] %vm450_vm4, %v2550_v7 }
 0x30a   : > { %670 = vperm.xlu1 %1793, %v2543_v2  }
 0x311   : > { %675 = vperm.xlu0 %1794, %v2550_v7  }
 0x315   : > { %1217 = vrot.lane.b32.xlu0 %v601_v3, %s2102_s17 }
 0x376   : > { %v821_v10 = vpop.xlane.xlu0 %820 }
 0x377   : > { %v2563_v11 = vmax.f32 %v2560_v9, %v821_v10 }
 0x379   : > { %v827_v13 = vsub.f32 %v2560_v9, %v2563_v11  ;;  %932 = vst.msk [vmem:[#allocation3 + $0x10] sm:$0xff] %vm450_vm4, %v2563_v11  ;;  %835 = vperm.xlu1 %1793, %v2563_v11  }
 0x37a   : > { %v824_v14 = vpop.xlane.xlu0 %823 }
 0x37b   : > { %v2573_v15 = vmax.f32 %v2565_v12, %v824_v14  ;;  %v829_v7 = vmul.f32 1.442695, %v827_v13 }
 0x37d   : > { %v828_v17 = vsub.f32 %v2565_v12, %v2573_v15  ;;  %933 = vst.msk [vmem:[#allocation3 + $0x18] sm:$0xff] %vm450_vm4, %v2573_v15  ;;  %840 = vperm.xlu1 %1793, %v2573_v15  }
 0x37e   : > { %v990_v18 = vpop.xlane.xlu1 %989 }
 0x37f   : > { %v2585_v20 = vmax.f32 %v2575_v16, %v990_v18  ;;  %v831_v63 = vmul.f32 1.442695, %v828_v17 }
 0x380   : > { %v993_v21 = vpop.xlane.xlu0 %992 }
 0x381   : > { %v996_v22 = vsub.f32 %v2575_v16, %v2585_v20  ;;  %1100 = vst.msk [vmem:[#allocation3 + $0x20] sm:$0xff] %vm450_vm4, %v2585_v20  ;;  %v2592_v23 = vmax.f32 %v2582_v19, %v993_v21  ;;  %1004 = vperm.xlu1 %1793, %v2585_v20  }
 0x383   : > { %v997_v24 = vsub.f32 %v2582_v19, %v2592_v23  ;;  %1101 = vst.msk [vmem:[#allocation3 + $0x28] sm:$0xff] %vm450_vm4, %v2592_v23  ;;  %v998_v59 = vmul.f32 1.442695, %v996_v22 }
 0x385   : > { %1009 = vperm.xlu1 %1793, %v2592_v23  }
 0x386   : > { %v1158_v26 = vpop.xlane.xlu1 %1157 }
 0x387   : > { %v2605_v28 = vmax.f32 %v2599_v25, %v1158_v26 }
 0x388   : > { %v1161_v29 = vpop.xlane.xlu0 %1160 }
 0x389   : > { %v1164_v30 = vsub.f32 %v2599_v25, %v2605_v28  ;;  %1268 = vst.msk [vmem:[#allocation3 + $0x30] sm:$0xff] %vm450_vm4, %v2605_v28  ;;  %v2612_v31 = vmax.f32 %v2602_v27, %v1161_v29  ;;  %1172 = vperm.xlu1 %1793, %v2605_v28   ;;  %v684_v25 = vld [vmem:[#allocation4] sm:$0xff] }
 0x38a   : > { %v671_v32 = vpop.permute.xlu1 %670 }
 0x38b   : > { %v1165_v34 = vsub.f32 %v2602_v27, %v2612_v31  ;;  %1269 = vst.msk [vmem:[#allocation3 + $0x38] sm:$0xff] %vm450_vm4, %v2612_v31  ;;  %v678_v35 = vsub.f32 %v2482_v33, %v671_v32 }
 0x38d   : > { %1177 = vperm.xlu1 %1793, %v2612_v31   ;;  %v680_v37 = vmul.f32 1.442695, %v678_v35  ;;  %v1168_v9 = vmul.f32 1.442695, %v1165_v34 }
 0x38f   : > { %1803 = vpow2.f32 %v680_v37 }
 0x390   : > { %v676_v38 = vpop.permute.xlu0 %675 }
 0x391   : > { %v679_v39 = vsub.f32 %v2486_v36, %v676_v38  ;;  %881 = vrot.lane.b32.xlu1 %v601_v3, %s2101_s26 }
 0x393   : > { %v682_v40 = vmul.f32 1.442695, %v679_v39 }
 0x394   : > { %v1218_v39 = vpop.permute.xlu0 %1217 }
 0x395   : > { %1805 = vpow2.f32 %v682_v40  ;;  %1049 = vrot.lane.b32.xlu1 %v601_v3, %s2100_s24 }
 0x399   : > { %v1804_v42 = vpop.eup %1803 }
 0x39a   : > { %v688_v33 = vsel %vm653_vm3, %v1804_v42, 0.0 }
 0x39f   : > { %v1806_v43 = vpop.eup %1805 }
 0x3a0   : > { %v691_v45 = vsel %vm653_vm3, %v1806_v43, 0.0  ;;  %v713_v46 = vpack.c.bf16 %v1806_v43, %v1804_v42  ;;  %v666_v42 = vmul.f32 1.442695, %v663_v8  ;;  %v1166_v8 = vmul.f32 1.442695, %v1164_v30 }
 0x3a1   : > { %692 = vadd.xlane.f32.xlu0 %v691_v45 }
 0x3a2   : > { %1643 = vmatmul.mubr.msk.bf16.vlgmr.msra.gmra.mrb[8].mxu0 %vm653_vm3, %v713_v46  ;;  %v664_v46 = vmul.f32 1.442695, %v662_v6  ;;  %v685_v6 = vld [vmem:[#allocation4 + $0x8] sm:$0xff] }
 0x3a3   : > { %1654 = vmatprep.mubr.msk.bf16.mxu0 %vm2099_vm0, %v2098_v0 }
 0x3b9   : > { %689 = vadd.xlane.f32.xlu1 %v688_v33 }
 0x3f8   : > { %v836_v36 = vpop.permute.xlu1 %835 }
 0x3f9   : > { %v843_v48 = vsub.f32 %v2514_v41, %v836_v36 }
 0x3fb   : > { %v845_v49 = vmul.f32 1.442695, %v843_v48 }
 0x3fc   : > { %v841_v51 = vpop.permute.xlu1 %840 }
 0x3fd   : > { %1807 = vpow2.f32 %v845_v49  ;;  %v844_v52 = vsub.f32 %v2518_v44, %v841_v51 }
 0x3ff   : > { %v847_v54 = vmul.f32 1.442695, %v844_v52  ;;  %v850_v52 = vld [vmem:[#allocation4 + $0x10] sm:$0xff] }
 0x400   : > { %v1005_v55 = vpop.permute.xlu1 %1004 }
 0x401   : > { %1809 = vpow2.f32 %v847_v54  ;;  %v1012_v57 = vsub.f32 %v2522_v47, %v1005_v55 }
 0x403   : > { %v1014_v58 = vmul.f32 1.442695, %v1012_v57  ;;  %v851_v57 = vld [vmem:[#allocation4 + $0x18] sm:$0xff] }
 0x404   : > { %v1010_v60 = vpop.permute.xlu1 %1009 }
 0x405   : > { %1811 = vpow2.f32 %v1014_v58  ;;  %v1013_v61 = vsub.f32 %v2526_v50, %v1010_v60 }
 0x407   : > { %v1808_v62 = vpop.eup %1807  ;;  %v1016_v1 = vmul.f32 1.442695, %v1013_v61 }
 0x408   : > { %v1173_v3 = vpop.permute.xlu1 %1172  ;;  %v854_v41 = vsel %vm653_vm3, %v1808_v62, 0.0 }
 0x409   : > { %1813 = vpow2.f32 %v1016_v1  ;;  %v1180_v4 = vsub.f32 %v2530_v53, %v1173_v3  ;;  %855 = vadd.xlane.f32.xlu1 %v854_v41 }
 0x40b   : > { %v1810_v44 = vpop.eup %1809  ;;  %v1182_v5 = vmul.f32 1.442695, %v1180_v4  ;;  %v1020_v4 = vld [vmem:[#allocation4 + $0x28] sm:$0xff] }
 0x40c   : > { %v1178_v10 = vpop.permute.xlu1 %1177  ;;  %v857_v14 = vsel %vm653_vm3, %v1810_v44, 0.0  ;;  %v879_v47 = vpack.c.bf16 %v1810_v44, %v1808_v62  ;;  %v1019_v62 = vld [vmem:[#allocation4 + $0x20] sm:$0xff] }
 0x40d   : > { %1815 = vpow2.f32 %v1182_v5  ;;  %v1181_v18 = vsub.f32 %v2534_v56, %v1178_v10  ;;  %858 = vadd.xlane.f32.xlu0 %v857_v14 }
 0x40f   : > { %v1812_v50 = vpop.eup %1811  ;;  %v1184_v21 = vmul.f32 1.442695, %v1181_v18 }
 0x410   : > { %v882_v26 = vpop.permute.xlu1 %881  ;;  %v1023_v29 = vsel %vm653_vm3, %v1812_v50, 0.0 }
 0x411   : > { %1817 = vpow2.f32 %v1184_v21  ;;  %1024 = vadd.xlane.f32.xlu1 %v1023_v29  ;;  %1653 = vmatpush3.bf16.msra.mxu0 %v882_v26  ;;  %v1188_v29 = vld [vmem:[#allocation4 + $0x38] sm:$0xff] }
 0x412   : > { %1664 = vmatprep.subr.bf16.mxu0 %v2098_v0  ;;  %1819 = vpow2.f32 %v666_v42 }
 0x413   : > { %v1814_v53 = vpop.eup %1813  ;;  %1821 = vpow2.f32 %v664_v46 }
 0x414   : > { %1655 = vmatmul.mubr.msk.bf16.vlgmr.msra.gmra.mrb[12].mxu0 %vm653_vm3, %v879_v47  ;;  %v1026_v32 = vsel %vm653_vm3, %v1814_v53, 0.0  ;;  %v1050_v35 = vpop.permute.xlu1 %1049  ;;  %v1048_v37 = vpack.c.bf16 %v1814_v53, %v1812_v50  ;;  %1823 = vpow2.f32 %v831_v63  ;;  %v1187_v47 = vld [vmem:[#allocation4 + $0x30] sm:$0xff] }
 0x415   : > { %1027 = vadd.xlane.f32.xlu0 %v1026_v32  ;;  %1665 = vmatpush3.bf16.msra.mxu0 %v1050_v35  ;;  %1825 = vpow2.f32 %v829_v7 }
 0x416   : > { %1666 = vmatprep.mubr.msk.bf16.mxu0 %vm2099_vm0, %v2098_v0  ;;  %1676 = vmatprep.subr.bf16.mxu0 %v2098_v0 }
 0x417   : > { %v1816_v56 = vpop.eup %1815 }
 0x418   : > { %v1191_v38 = vsel %vm653_vm3, %v1816_v56, 0.0 }
 0x419   : > { %1192 = vadd.xlane.f32.xlu0 %v1191_v38 }
 0x41b   : > { %v1818_v40 = vpop.eup %1817 }
 0x41c   : > { %1667 = vmatmul.mubr.msk.bf16.vlgmr.msra.gmra.mrb[16].mxu0 %vm653_vm3, %v1048_v37  ;;  %v1194_v43 = vsel %vm653_vm3, %v1818_v40, 0.0  ;;  %v1216_v45 = vpack.c.bf16 %v1818_v40, %v1816_v56  ;;  %v1820_v2 = vpop.eup %1819  ;;  %v700_v40 = vld [vmem:[#allocation5 + $0x8] sm:$0xff] }
 0x41d   : > { %1195 = vadd.xlane.f32.xlu1 %v1194_v43  ;;  %1677 = vmatpush3.bf16.msra.mxu0 %v1218_v39  ;;  %v687_v11 = vmul.f32 %v1820_v2, %v685_v6  ;;  %v1822_v12 = vpop.eup %1821  ;;  %v699_v39 = vld [vmem:[#allocation5] sm:$0xff] }
 0x41e   : > { %1678 = vmatprep.mubr.msk.bf16.mxu0 %vm2099_vm0, %v2098_v0  ;;  %v1000_v0 = vmul.f32 1.442695, %v997_v24  ;;  %v1824_v16 = vpop.eup %1823  ;;  %v686_v28 = vmul.f32 %v1822_v12, %v684_v25 }
 0x41f   : > { %v1826_v17 = vpop.eup %1825  ;;  %v853_v60 = vmul.f32 %v1824_v16, %v851_v57 }
 0x420   : > { %1827 = vpow2.f32 %v1000_v0  ;;  %v852_v54 = vmul.f32 %v1826_v17, %v850_v52 }
 0x421   : > { %1829 = vpow2.f32 %v998_v59 }
 0x422   : > { %1831 = vpow2.f32 %v1166_v8 }
 0x423   : > { %1833 = vpow2.f32 %v1168_v9 }
 0x424   : > { %1679 = vmatmul.mubr.msk.bf16.vlgmr.msra.gmra.mrb[20].mxu0 %vm653_vm3, %v1216_v45 }
 0x42a   : > { %v1828_v19 = vpop.eup %1827 }
 0x42b   : > { %v1830_v20 = vpop.eup %1829  ;;  %v1022_v10 = vmul.f32 %v1828_v19, %v1020_v4 }
 0x42c   : > { %v1832_v23 = vpop.eup %1831  ;;  %v1021_v3 = vmul.f32 %v1830_v20, %v1019_v62 }
 0x42d   : > { %v1834_v24 = vpop.eup %1833  ;;  %v1189_v21 = vmul.f32 %v1832_v23, %v1187_v47 }
 0x42e   : > { %v693_v13 = vpop.xlane.xlu0 %692  ;;  %708 = vperm.xlu1 %1793, %v1820_v2   ;;  %v1190_v35 = vmul.f32 %v1834_v24, %v1188_v29 }
 0x42f   : > { %v695_v15 = vadd.f32 %v693_v13, %v687_v11  ;;  %703 = vperm.xlu0 %1794, %v1822_v12   ;;  %v865_v13 = vld [vmem:[#allocation5 + $0x10] sm:$0xff] }
 0x431   : > { %698 = vst.msk [vmem:[#allocation4 + $0x8] sm:$0xff] %vm450_vm4, %v695_v15 }
 0x432   : > { %874 = vperm.xlu1 %1793, %v1824_v16   ;;  %v866_v16 = vld [vmem:[#allocation5 + $0x18] sm:$0xff] }
 0x433   : > { %869 = vperm.xlu0 %1794, %v1826_v17  }
 0x436   : > { %1043 = vperm.xlu1 %1793, %v1828_v19  }
 0x437   : > { %1038 = vperm.xlu0 %1794, %v1830_v20  }
 0x438   : > { %v1274_v22 = vld [vmem:[#allocation4 + $0x8] sm:$0xff] }
 0x439   : > { %1835 = vrcp.f32 %v1274_v22 }
 0x43a   : > { %1206 = vperm.xlu1 %1793, %v1832_v23  }
 0x43b   : > { %1211 = vperm.xlu0 %1794, %v1834_v24  }
 0x443   : > { %v1836_v27 = vpop.eup %1835 }
 0x444   : > { %1286 = vperm.xlu0 %1794, %v1836_v27  }
 0x446   : > { %v690_v30 = vpop.xlane.xlu1 %689 }
 0x447   : > { %v694_v31 = vadd.f32 %v690_v30, %v686_v28  ;;  %v1034_v30 = vld [vmem:[#allocation5 + $0x20] sm:$0xff] }
 0x449   : > { %697 = vst.msk [vmem:[#allocation4] sm:$0xff] %vm450_vm4, %v694_v31 }
 0x450   : > { %v1273_v34 = vld [vmem:[#allocation4] sm:$0xff] }
 0x451   : > { %1837 = vrcp.f32 %v1273_v34  ;;  %v1035_v34 = vld [vmem:[#allocation5 + $0x28] sm:$0xff] }
 0x45b   : > { %v1838_v33 = vpop.eup %1837 }
 0x45c   : > { %1281 = vperm.xlu1 %1793, %v1838_v33  }
 0x475   : > { %v751_v36 = vpop.f32.mrb[8].mxu0 }
 0x476   : > { %v1644_v48 = vpop.f32.mrb[9].mxu0 }
 0x477   : > { %v754_v49 = vpop.f32.mrb[10].mxu0 }
 0x478   : > { %v1645_v51 = vpop.f32.mrb[11].mxu0 }
 0x496   : > { %v856_v55 = vpop.xlane.xlu1 %855 }
 0x497   : > { %v860_v58 = vadd.f32 %v856_v55, %v852_v54 }
 0x499   : > { %862 = vst.msk [vmem:[#allocation4 + $0x10] sm:$0xff] %vm450_vm4, %v860_v58  ;;  %v1202_v58 = vld [vmem:[#allocation5 + $0x30] sm:$0xff] }
 0x49a   : > { %v859_v61 = vpop.xlane.xlu0 %858 }
 0x49b   : > { %v861_v1 = vadd.f32 %v859_v61, %v853_v60  ;;  %v1203_v61 = vld [vmem:[#allocation5 + $0x38] sm:$0xff] }
 0x49d   : > { %863 = vst.msk [vmem:[#allocation4 + $0x18] sm:$0xff] %vm450_vm4, %v861_v1 }
 0x49e   : > { %v1025_v41 = vpop.xlane.xlu1 %1024 }
 0x49f   : > { %v1029_v44 = vadd.f32 %v1025_v41, %v1021_v3 }
 0x4a0   : > { %v1291_v5 = vld [vmem:[#allocation4 + $0x10] sm:$0xff] }
 0x4a1   : > { %1031 = vst.msk [vmem:[#allocation4 + $0x20] sm:$0xff] %vm450_vm4, %v1029_v44  ;;  %1839 = vrcp.f32 %v1291_v5 }
 0x4a2   : > { %v1028_v14 = vpop.xlane.xlu0 %1027 }
 0x4a3   : > { %v1030_v18 = vadd.f32 %v1028_v14, %v1022_v10 }
 0x4a4   : > { %v1292_v50 = vld [vmem:[#allocation4 + $0x18] sm:$0xff] }
 0x4a5   : > { %1032 = vst.msk [vmem:[#allocation4 + $0x28] sm:$0xff] %vm450_vm4, %v1030_v18  ;;  %1841 = vrcp.f32 %v1292_v50 }
 0x4a6   : > { %v1193_v26 = vpop.xlane.xlu0 %1192 }
 0x4a7   : > { %v1197_v53 = vadd.f32 %v1193_v26, %v1189_v21 }
 0x4a8   : > { %v1309_v32 = vld [vmem:[#allocation4 + $0x20] sm:$0xff] }
 0x4a9   : > { %1199 = vst.msk [vmem:[#allocation4 + $0x30] sm:$0xff] %vm450_vm4, %v1197_v53  ;;  %1843 = vrcp.f32 %v1309_v32 }
 0x4aa   : > { %v1196_v37 = vpop.xlane.xlu1 %1195 }
 0x4ab   : > { %v1840_v56 = vpop.eup %1839  ;;  %v1198_v38 = vadd.f32 %v1196_v37, %v1190_v35 }
 0x4ac   : > { %1299 = vperm.xlu1 %1793, %v1840_v56   ;;  %v1310_v42 = vld [vmem:[#allocation4 + $0x28] sm:$0xff] }
 0x4ad   : > { %1200 = vst.msk [vmem:[#allocation4 + $0x38] sm:$0xff] %vm450_vm4, %v1198_v38  ;;  %1845 = vrcp.f32 %v1310_v42 }
 0x4ae   : > { %v704_v43 = vpop.permute.xlu0 %703  ;;  %v709_v45 = vpop.permute.xlu1 %708 }
 0x4af   : > { %v1842_v46 = vpop.eup %1841  ;;  %v711_v63 = vmul.f32 %v704_v43, %v699_v39  ;;  %v712_v7 = vmul.f32 %v709_v45, %v700_v40 }
 0x4b0   : > { %1304 = vperm.xlu0 %1794, %v1842_v46   ;;  %v1327_v0 = vld [vmem:[#allocation4 + $0x30] sm:$0xff] }
 0x4b1   : > { %v758_v59 = vadd.f32 %v751_v36, %v711_v63  ;;  %v759_v2 = vadd.f32 %v754_v49, %v712_v7  ;;  %1847 = vrcp.f32 %v1327_v0 }
 0x4b2   : > { %v870_v15 = vpop.permute.xlu0 %869  ;;  %v875_v17 = vpop.permute.xlu1 %874 }
 0x4b3   : > { %v1844_v6 = vpop.eup %1843  ;;  %760 = vst.msk [vmem:[#allocation5] sm:$0xff] %vm432_vm2, %v758_v59  ;;  %761 = vst.msk [vmem:[#allocation5 + $0x8] sm:$0xff] %vm432_vm2, %v759_v2  ;;  %v877_v19 = vmul.f32 %v870_v15, %v865_v13  ;;  %v878_v22 = vmul.f32 %v875_v17, %v866_v16 }
 0x4b4   : > { %1317 = vperm.xlu1 %1793, %v1844_v6   ;;  %v1328_v8 = vld [vmem:[#allocation4 + $0x38] sm:$0xff] }
 0x4b5   : > { %1849 = vrcp.f32 %v1328_v8 }
 0x4b6   : > { %v1039_v31 = vpop.permute.xlu0 %1038  ;;  %v1044_v33 = vpop.permute.xlu1 %1043 }
 0x4b7   : > { %v1846_v9 = vpop.eup %1845  ;;  %v1046_v36 = vmul.f32 %v1039_v31, %v1034_v30  ;;  %v1047_v49 = vmul.f32 %v1044_v33, %v1035_v34 }
 0x4b8   : > { %1322 = vperm.xlu0 %1794, %v1846_v9  }
 0x4ba   : > { %v1207_v60 = vpop.permute.xlu1 %1206  ;;  %v1212_v62 = vpop.permute.xlu0 %1211  ;;  %v1277_v59 = vld [vmem:[#allocation5] sm:$0xff] }
 0x4bb   : > { %v1848_v11 = vpop.eup %1847  ;;  %v1214_v1 = vmul.f32 %v1207_v60, %v1202_v58  ;;  %v1215_v41 = vmul.f32 %v1212_v62, %v1203_v61 }
 0x4bc   : > { %1335 = vperm.xlu1 %1793, %v1848_v11   ;;  %v1278_v11 = vld [vmem:[#allocation5 + $0x8] sm:$0xff] }
 0x4bf   : > { %v1850_v12 = vpop.eup %1849 }
 0x4c0   : > { %1340 = vperm.xlu0 %1794, %v1850_v12  }
 0x4c3   : > { %v1287_v18 = vpop.permute.xlu0 %1286 }
 0x4c4   : > { %v1290_v16 = vmul.f32 %v1287_v18, %v1278_v11 }
 0x4db   : > { %v1282_v47 = vpop.permute.xlu1 %1281 }
 0x4dc   : > { %v1289_v8 = vmul.f32 %v1282_v47, %v1277_v59 }
 0x4e7   : > { %v921_v20 = vpop.f32.mrb[12].mxu0 }
 0x4e8   : > { %v928_v23 = vadd.f32 %v921_v20, %v877_v19  ;;  %v1656_v24 = vpop.f32.mrb[13].mxu0 }
 0x4e9   : > { %v924_v25 = vpop.f32.mrb[14].mxu0 }
 0x4ea   : > { %930 = vst.msk [vmem:[#allocation5 + $0x10] sm:$0xff] %vm432_vm2, %v928_v23  ;;  %v929_v27 = vadd.f32 %v924_v25, %v878_v22  ;;  %v1657_v28 = vpop.f32.mrb[15].mxu0 }
 0x4ec   : > { %931 = vst.msk [vmem:[#allocation5 + $0x18] sm:$0xff] %vm432_vm2, %v929_v27 }
 0x4ef   : > { %v1089_v48 = vpop.f32.mrb[16].mxu0 }
 0x4f0   : > { %v1096_v51 = vadd.f32 %v1089_v48, %v1046_v36  ;;  %v1668_v52 = vpop.f32.mrb[17].mxu0 }
 0x4f1   : > { %v1092_v54 = vpop.f32.mrb[18].mxu0  ;;  %v1295_v21 = vld [vmem:[#allocation5 + $0x10] sm:$0xff] }
 0x4f2   : > { %1098 = vst.msk [vmem:[#allocation5 + $0x20] sm:$0xff] %vm432_vm2, %v1096_v51  ;;  %v1097_v55 = vadd.f32 %v1092_v54, %v1047_v49  ;;  %v1669_v57 = vpop.f32.mrb[19].mxu0 }
 0x4f3   : > { %v1296_v53 = vld [vmem:[#allocation5 + $0x18] sm:$0xff] }
 0x4f4   : > { %1099 = vst.msk [vmem:[#allocation5 + $0x28] sm:$0xff] %vm432_vm2, %v1097_v55 }
 0x4f7   : > { %v1257_v3 = vpop.f32.mrb[20].mxu0 }
 0x4f8   : > { %v1264_v4 = vadd.f32 %v1257_v3, %v1214_v1  ;;  %v1680_v44 = vpop.f32.mrb[21].mxu0 }
 0x4f9   : > { %v1260_v5 = vpop.f32.mrb[22].mxu0  ;;  %v1313_v37 = vld [vmem:[#allocation5 + $0x20] sm:$0xff] }
 0x4fa   : > { %1266 = vst.msk [vmem:[#allocation5 + $0x30] sm:$0xff] %vm432_vm2, %v1264_v4  ;;  %v1265_v10 = vadd.f32 %v1260_v5, %v1215_v41  ;;  %v1681_v14 = vpop.f32.mrb[23].mxu0 }
 0x4fb   : > { %v1314_v39 = vld [vmem:[#allocation5 + $0x28] sm:$0xff] }
 0x4fc   : > { %1267 = vst.msk [vmem:[#allocation5 + $0x38] sm:$0xff] %vm432_vm2, %v1265_v10 }
 0x501   : > { %v1331_v43 = vld [vmem:[#allocation5 + $0x30] sm:$0xff] }
 0x503   : > { %v1332_v63 = vld [vmem:[#allocation5 + $0x38] sm:$0xff] }
 0x52b   : > { %v1300_v50 = vpop.permute.xlu1 %1299 }
 0x52c   : > { %v1307_v26 = vmul.f32 %v1300_v50, %v1295_v21 }
 0x52e   : > { %1347 = vrot.lane.b32.xlu1 %v1307_v26, %s2105_s25 }
 0x52f   : > { %v1305_v29 = vpop.permute.xlu0 %1304 }
 0x530   : > { %v1308_v32 = vmul.f32 %v1305_v29, %v1296_v53 }
 0x532   : > { %1349 = vrot.lane.b32.xlu0 %v1308_v32, %s2105_s25 }
 0x533   : > { %v1318_v35 = vpop.permute.xlu1 %1317 }
 0x534   : > { %v1325_v56 = vmul.f32 %v1318_v35, %v1313_v37 }
 0x536   : > { %1355 = vrot.lane.b32.xlu1 %v1325_v56, %s2106_s30 }
 0x537   : > { %v1323_v38 = vpop.permute.xlu0 %1322 }
 0x538   : > { %v1326_v40 = vmul.f32 %v1323_v38, %v1314_v39 }
 0x53a   : > { %1357 = vrot.lane.b32.xlu0 %v1326_v40, %s2106_s30 }
 0x53b   : > { %v1336_v42 = vpop.permute.xlu1 %1335 }
 0x53c   : > { %v1343_v45 = vmul.f32 %v1336_v42, %v1331_v43 }
 0x53e   : > { %1363 = vrot.lane.b32.xlu1 %v1343_v45, %s2107_s13 }
 0x53f   : > { %v1341_v46 = vpop.permute.xlu0 %1340 }
 0x540   : > { %v1344_v7 = vmul.f32 %v1341_v46, %v1332_v63 }
 0x542   : > { %1365 = vrot.lane.b32.xlu0 %v1344_v7, %s2107_s13 }
 0x5a0   : > { %v1348_v0 = vpop.permute.xlu1 %1347 }
 0x5a1   : > { %v1369_v9 = vsel %vm432_vm2, %v1289_v8, %v1348_v0 }
 0x5a4   : > { %v1350_v2 = vpop.permute.xlu0 %1349 }
 0x5a5   : > { %v1370_v19 = vsel %vm432_vm2, %v1290_v16, %v1350_v2 }
 0x5a8   : > { %v1356_v6 = vpop.permute.xlu1 %1355 }
 0x5a9   : > { %v1371_v12 = vsel %vm653_vm3, %v1369_v9, %v1356_v6 }
 0x5ac   : > { %v1358_v13 = vpop.permute.xlu0 %1357 }
 0x5ad   : > { %v1372_v20 = vsel %vm653_vm3, %v1370_v19, %v1358_v13 }
 0x5b0   : > { %v1364_v15 = vpop.permute.xlu1 %1363 }
 0x5b1   : > { %v1374_v17 = vsel %vm1373_vm5, %v1371_v12, %v1364_v15 }
 0x5b2   : > { %1376 = vst.msk [vmem:[%s354_s10] sm:$0xff] %vm386_vm1, %v1374_v17 }
 0x5b4   : > { %v1366_v22 = vpop.permute.xlu0 %1365 }
 0x5b5   : > { %v1375_v23 = vsel %vm1373_vm5, %v1372_v20, %v1366_v22 }
 0x5b6   : > { %1377 = vst.msk [vmem:[%s354_s10 + $0x8] sm:$0xff] %vm386_vm1, %v1375_v23 }
 0x5b7   : > { %2008 = shalt.err (!%p2005_p7)
}
 0x5b8   : > { %s2009_s28 = scalar_lea.hbm %s2705_s14, 256  ;;  %s2013_s17 = scalar_lea.hbm %s2762_s5, 512 }
 0x5b9   : > { %p2010_p12 = scmp.ne.s32.totalorder %s2705_s14, %s2009_s28  ;;  %p2014_p9 = scmp.lt.u32.totalorder %s2705_s14, %s2762_s5 }
 0x5ba   : > { %p2015_p0 = scmp.lt.u32.totalorder %s2013_s17, %s2009_s28  ;;  %p2017_p4 = scmp.lt.u32.totalorder %s2009_s28, %s2705_s14 }
 0x5bb   : > { %p2011_p6 = pnand %p2010_p12, %p2296_p10 }
 0x5bc   : > { %p2016_p2 = por %p2015_p0, %p2014_p9 }
 0x5bd   : > { %p2012_p11 = pneg %p2011_p6 }
 0x5be   : > { %p2018_p8 = por %p2017_p4, %p2016_p2 }
 0x5c0   : > { %p2019_p1 = pnand %p2018_p8, %p2012_p11 }
 0x5c2   : > { %2022 = shalt.err (!%p2019_p1)
}
 0x5c3   : > { %s2109_s3 = smov 128  }
 0x5c4   : > { %1698 = dma.vmem_to_hbm [thread:$0]  (%p2296_p10), %s2699_s9, 256, %s2705_s14, %s1379_s21, %s2109_s3, %s2109_s3, %s2105_s25  }
 0x5c5 PF: > { %s2794_s10 = sld [smem:[#allocation21_spill]]  ;;  %s1409_s29 = sand.u32 1, %s2069_s18  }
 0x5c6   : > { %p2796_p3 = scmp.ge.s32.totalorder %s2089_s23, 2  ;;  %s1410_s8 = scalar_lea.sflag [#allocation8], %s1409_s29 }
 0x5cb   : > { %p2795_p13 = scmp.ne.s32.totalorder %s2794_s10, 0 }
 0x5cd   : > { %p1718_p5 = pnand %p2796_p3, %p2795_p13 }
 0x5cf   : > { %2064 = dma.done.wait (!%p1718_p5), %s1410_s8, 256  }
 0x5d0   : > { %2066 = vsyncadd (!%p1718_p5), %s1410_s8, 4294967040  ;;  %s25_s23 = sadd.s32 1, %s2089_s23   ;;  %s2797_s18 = smov %s2073_s19 }
 0x5d1   : > { %p22_p7 = scmp.ge.s32.totalorder %s25_s23, 4   ;;  %s2798_s19 = smov %s2077_s20 }
 0x5d2   : > { %s2799_s20 = smov %s2308_s15  ;;  %s2800_s21 = smov %s2085_s22 }
 0x5d3   : > { %s2801_s22 = smov %s2803_s6  ;;  %24 = sbr.rel (!%p22_p7) target bundleno = 13 (0xd), region = 133 }
 0x5da   :  { %1415 = vsyncpa [#allocation7], 1 }
 0x5db   :  { %1417 = vsyncpa [#allocation7 + $0x1], 1 }
 0x5dc   :  { %1418 = vsyncpa [#allocation10], 1 }
 0x5dd   :  { %1420 = vsyncpa [#allocation10 + $0x1], 1 }
 0x5de   :  { %1421 = vsyncpa [#allocation13], 1 }
 0x5df   :  { %1422 = vsyncpa [#allocation8], 1 }
 0x5e0   :  { %1424 = vsyncpa [#allocation8 + $0x1], 1 }

</bundles_post_ra>
